<compile_context>
chip_gen: v7x
topology: tpu7x:2x2x1
jax: 0.10.0
libtpu: 0.0.40
codegen_flags: <defaults>
</compile_context>

<pallas_src>
import math
import functools

import jax
import jax.numpy as jnp
from jax.experimental import pallas as pl
from jax.experimental.pallas import tpu as pltpu


# ---------------------------------------------------------------------------
# Pallas kernel: fused scores + mask + softmax + probs@V for one
# (batch_block*heads, q_tile, d_k) query block against whole-Sk K/V blocks.
# ---------------------------------------------------------------------------
def _sdpa_kernel(*refs, batch_per_block, heads, mask_mode, exact_softmax):
    if mask_mode == "dense":
        q_ref, k_ref, v_ref, mask_ref, o_ref = refs
    else:
        q_ref, k_ref, v_ref, o_ref = refs
        mask_ref = None

    G, TQ, _ = q_ref.shape          # G = batch_per_block * heads
    Sk = k_ref.shape[1]
    f32 = jnp.float32

    # Scores (already scaled: 1/sqrt(d_k) folded into Wq).  Batch and head form
    # a single leading batch dim of one 3-D dot_general -> no K^T, no loops.
    s = jnp.einsum("bqd,bkd->bqk", q_ref[...], k_ref[...],
                   preferred_element_type=f32)                      # (G,TQ,Sk)

    if mask_mode == "causal":
        # No-peak mask built from iota using the q-tile offset: zero mask DMA.
        q0 = pl.program_id(1) * TQ
        rows = jax.lax.broadcasted_iota(jnp.int32, (TQ, Sk), 0) + q0
        cols = jax.lax.broadcasted_iota(jnp.int32, (TQ, Sk), 1)
        s = s + jnp.where(cols <= rows, f32(0.0), f32(-1e9))[None]
    elif mask_mode == "dense":
        # int8 mask block (BB, TQ, Sk): nonzero = keep.  Bias computed once per
        # block and broadcast over heads via a free leading-dim reshape.
        bias = jnp.where(mask_ref[...] == 0, f32(-1e9), f32(0.0))   # (BB,TQ,Sk)
        s = (s.reshape(batch_per_block, heads, TQ, Sk) + bias[:, None]
             ).reshape(G, TQ, Sk)

    # Softmax in f32.
    m = jnp.max(s, axis=-1, keepdims=True)
    p = jnp.exp(s - m)
    l = jnp.sum(p, axis=-1, keepdims=True)
    if exact_softmax:
        p = p / l                                  # exact divide (f32 path)
    else:
        p = p * pl.reciprocal(l, approx=True)      # EUP slot, ~free (bf16 path)

    # probs @ V, batched over (batch, head).
    o_ref[...] = jnp.einsum("bqk,bkd->bqd", p.astype(v_ref.dtype), v_ref[...],
                            preferred_element_type=f32).astype(o_ref.dtype)


# ---------------------------------------------------------------------------
# Tiling helpers.
# ---------------------------------------------------------------------------
def _round_up(x, m):
    return -(-x // m) * m


def _largest_divisor_leq(n, cap):
    cap = max(1, min(n, cap))
    for d in range(cap, 0, -1):
        if n % d == 0:
            return d
    return 1


def _pick_q_tile(sq, cap, cdt):
    if sq <= cap:
        return sq
    mults = (16, 8) if jnp.dtype(cdt).itemsize == 2 else (8,)
    for mult in mults:
        for t in range(min(cap, sq), mult - 1, -1):
            if sq % t == 0 and t % mult == 0:
                return t
    # No aligned divisor (e.g. Sq=100): fall back to the whole sequence, which
    # is always a legal block (block dim == full array dim).
    return sq


# ---------------------------------------------------------------------------
# Wrapper: projections (XLA GEMMs, run once) + Pallas attention core +
# combine_heads/Wo einsum.
# ---------------------------------------------------------------------------
def multi_head_attention(q, k, v, mask=None, params=None, *, num_heads,
                         causal=False, q_tile=256, bh_block=None,
                         compute_dtype=jnp.bfloat16, out_dtype=jnp.float32,
                         exact_softmax=None):
    """Forward of the PyTorch MultiHeadAttention module.

    q: (B, Sq, D); k, v: (B, Sk, D); mask: (B, Sq, Sk) with nonzero = keep
    (matching torch's masked_fill(mask == 0, -1e9)) or None.  causal=True
    builds the decoder's no-peak mask in-kernel instead of shipping it.
    params: weights wq/wk/wv/wo stored (in, out) so y = x @ W + b, biases (1,D).
    compute_dtype: bf16 (default; MXU-native on v5e/v6e/v7x, accumulation and
    softmax stay f32) or f32 for module-exact semantics.
    """
    B, Sq, D = q.shape
    Sk = k.shape[1]
    H = num_heads
    assert D % H == 0, "d_model must be divisible by num_heads"
    d_k = D // H
    scale = 1.0 / math.sqrt(d_k)

    cdt = jnp.dtype(compute_dtype)
    f32 = jnp.float32
    if exact_softmax is None:
        exact_softmax = cdt == jnp.dtype(jnp.float32)
    if causal:
        mask_mode = "causal"
    elif mask is not None:
        mask_mode = "dense"
    else:
        mask_mode = "none"

    # ---- Projections: full-width MXU GEMMs, computed exactly once (K/V are
    #      never recomputed per q-tile).  1/sqrt(d_k) is folded into Wq/bq.
    def project(x, w, b):
        y = jnp.dot(x.reshape(-1, D).astype(cdt), w.astype(cdt),
                    preferred_element_type=f32) + b[0].astype(f32)
        return y.reshape(x.shape[0], x.shape[1], D)

    def split_heads(y):
        # (B, S, D) -> (B*H, S, d_k); this relayout runs in XLA, not in-kernel.
        b, s, _ = y.shape
        return (y.reshape(b, s, H, d_k).transpose(0, 2, 1, 3)
                 .reshape(b * H, s, d_k).astype(cdt))

    qh = split_heads(project(q, params["wq"] * scale, params["bq"] * scale))
    kh = split_heads(project(k, params["wk"], params["bk"]))
    vh = split_heads(project(v, params["wv"], params["bv"]))

    # ---- Tiling: q-tile + a (batch*heads) block covering whole batch rows so
    #      the (B, Sq, Sk) mask block lines up.  Target >= ~512 MXU rows/step.
    TQ = _pick_q_tile(Sq, q_tile, cdt)
    if bh_block is None:
        BB = _largest_divisor_leq(B, max(1, 512 // max(H * TQ, 1)))
    else:
        assert bh_block % H == 0 and B % (bh_block // H) == 0
        BB = bh_block // H
    G = BB * H
    grid = (B // BB, Sq // TQ)

    kernel = functools.partial(_sdpa_kernel, batch_per_block=BB, heads=H,
                               mask_mode=mask_mode,
                               exact_softmax=exact_softmax)

    in_specs = [
        pl.BlockSpec((G, TQ, d_k), lambda g, t: (g, t, 0)),
        pl.BlockSpec((G, Sk, d_k), lambda g, t: (g, 0, 0)),
        pl.BlockSpec((G, Sk, d_k), lambda g, t: (g, 0, 0)),
    ]
    args = [qh, kh, vh]
    if mask_mode == "dense":
        in_specs.append(pl.BlockSpec((BB, TQ, Sk), lambda g, t: (g, t, 0)))
        args.append((jnp.broadcast_to(mask, (B, Sq, Sk)) != 0).astype(jnp.int8))
    out_spec = pl.BlockSpec((G, TQ, d_k), lambda g, t: (g, t, 0))
    attn_dtype = cdt  # bf16 writeback on the default path, f32 on the exact one

    # ---- Generation-aware VMEM budget (generous: d_k lane padding plus the
    #      f32 score/prob temporaries), clamped to 85% of physical VMEM.
    try:
        cap = int(getattr(pltpu.get_tpu_info(), "vmem_capacity_bytes",
                          64 * 1024 * 1024))
    except Exception:
        cap = 64 * 1024 * 1024
    dk_pad, sk_pad = _round_up(d_k, 128), _round_up(Sk, 128)
    tq_pad, sk_sub = _round_up(TQ, 8), _round_up(Sk, 8)
    blocks = (G * tq_pad * dk_pad * cdt.itemsize
              + 2 * G * sk_sub * dk_pad * cdt.itemsize
              + G * tq_pad * dk_pad * jnp.dtype(attn_dtype).itemsize
              + (BB * tq_pad * sk_pad if mask_mode == "dense" else 0))
    temps = 4 * G * tq_pad * sk_pad * 4 + 2 * G * tq_pad * dk_pad * 4
    vmem_limit = int(min(max(2 * blocks + temps, 32 * 1024 * 1024),
                         int(0.85 * cap)))

    attn = pl.pallas_call(
        kernel,
        out_shape=jax.ShapeDtypeStruct((B * H, Sq, d_k), attn_dtype),
        grid=grid,
        in_specs=in_specs,
        out_specs=out_spec,
        compiler_params=pltpu.CompilerParams(
            dimension_semantics=("parallel", "parallel"),
            vmem_limit_bytes=vmem_limit),
    )(*args)

    # ---- combine_heads fused with the output projection: the contraction runs
    #      over (head, d_k) so the Wo GEMM's K dimension is the full d_model.
    attn = attn.reshape(B, H, Sq, d_k)
    wo_hd = params["wo"].reshape(H, d_k, D).astype(cdt)
    out = jnp.einsum("bhsd,hdD->bsD", attn, wo_hd,
                     preferred_element_type=f32) + params["bo"][0].astype(f32)
    return out.astype(out_dtype)


# ---------------------------------------------------------------------------
# Pure-JAX reference mirroring the PyTorch module exactly (f32).
# ---------------------------------------------------------------------------
def _reference_mha(q, k, v, mask, params, *, num_heads):
    B, Sq, D = q.shape
    Sk = k.shape[1]
    d_k = D // num_heads

    def lin(x, w, b):
        return x @ w + b[0]

    Q = lin(q, params["wq"], params["bq"]).reshape(
        B, Sq, num_heads, d_k).transpose(0, 2, 1, 3)
    K = lin(k, params["wk"], params["bk"]).reshape(
        B, Sk, num_heads, d_k).transpose(0, 2, 1, 3)
    V = lin(v, params["wv"], params["bv"]).reshape(
        B, Sk, num_heads, d_k).transpose(0, 2, 1, 3)
    scores = jnp.einsum("bhqd,bhkd->bhqk", Q, K) / math.sqrt(d_k)
    if mask is not None:
        scores = jnp.where(mask[:, None, :, :] == 0, -1e9, scores)
    probs = jax.nn.softmax(scores, axis=-1)
    attn = jnp.einsum("bhqk,bhkd->bhqd", probs, V)
    attn = attn.transpose(0, 2, 1, 3).reshape(B, Sq, D)
    return lin(attn, params["wo"], params["bo"])


def init_params(key, d_model):
    """Deterministic PyTorch-Linear-style init; weights stored as (in, out)."""
    bound = 1.0 / math.sqrt(d_model)
    keys = jax.random.split(key, 8)
    names = ["wq", "bq", "wk", "bk", "wv", "bv", "wo", "bo"]
    params = {}
    for i, name in enumerate(names):
        shape = (d_model, d_model) if name.startswith("w") else (1, d_model)
        params[name] = jax.random.uniform(keys[i], shape, jnp.float32,
                                          -bound, bound)
    return params


if __name__ == "__main__":
    # Small shapes consistent with the module: num_heads=8 as in the spec,
    # d_model a multiple of 128 so matmul operands and outputs are lane-dense.
    B, S, D, H = 4, 16, 128, 8

    key = jax.random.PRNGKey(0)
    kq, kk, kv, kp = jax.random.split(key, 4)
    q = jax.random.normal(kq, (B, S, D), jnp.float32)
    params = init_params(kp, D)

    # 1) Self-attention with the decoder's causal ("no-peak") mask built
    #    in-kernel from iota; bf16 MXU operands (default path).
    causal_mask = jnp.broadcast_to(
        jnp.tril(jnp.ones((S, S), jnp.float32))[None], (B, S, S))
    ref1 = _reference_mha(q, q, q, causal_mask, params, num_heads=H)
    out1 = multi_head_attention(q, q, q, params=params, num_heads=H,
                                causal=True)
    out1 = jax.block_until_ready(out1)
    assert out1.shape == (B, S, D)
    assert jnp.allclose(out1, ref1, rtol=5e-2, atol=5e-2), \
        "bf16 causal kernel mismatch vs reference"

    # 2) Cross-attention with an arbitrary (padding) mask shipped as int8,
    #    multi-step grid (2 batch blocks x 2 q-tiles), exact f32 path.
    Sk = 32
    k2 = jax.random.normal(kk, (B, Sk, D), jnp.float32)
    v2 = jax.random.normal(kv, (B, Sk, D), jnp.float32)
    pad = (jnp.arange(Sk) < Sk - 4).astype(jnp.float32)
    mask2 = jnp.broadcast_to(pad[None, None, :], (B, S, Sk))
    ref2 = _reference_mha(q, k2, v2, mask2, params, num_heads=H)
    out2 = multi_head_attention(q, k2, v2, mask=mask2, params=params,
                                num_heads=H, q_tile=8, bh_block=2 * H,
                                compute_dtype=jnp.float32)
    out2 = jax.block_until_ready(out2)
    assert jnp.allclose(out2, ref2, rtol=2e-3, atol=2e-3), \
        "f32 masked kernel mismatch vs reference"

    print("KERNEL_OK")
</pallas_src>

<mosaic_0001>
module attributes {stable_mosaic.version = 11 : i64} {
  func.func @_sdpa_kernel(%arg0: i32, %arg1: i32, %arg2: memref<32x16x16xbf16, #tpu.memory_space<vmem>>, %arg3: memref<32x16x16xbf16, #tpu.memory_space<vmem>>, %arg4: memref<32x16x16xbf16, #tpu.memory_space<vmem>>, %arg5: memref<32x16x16xbf16, #tpu.memory_space<vmem>>) attributes {dimension_semantics = [#tpu.dimension_semantics<parallel>, #tpu.dimension_semantics<parallel>], iteration_bounds = array<i64: 1, 1>, scalar_prefetch = 0 : i64, scratch_operands = 0 : i64, tpu.core_type = #tpu.core_type<tc>, window_params = [{transform_indices = @transform_0, window_bounds = array<i64: 32, 16, 16>}, {transform_indices = @transform_1, window_bounds = array<i64: 32, 16, 16>}, {transform_indices = @transform_2, window_bounds = array<i64: 32, 16, 16>}, {transform_indices = @transform_3, window_bounds = array<i64: 32, 16, 16>}]} {
    %c0 = arith.constant 0 : index
    %c0_0 = arith.constant 0 : index
    %c0_1 = arith.constant 0 : index
    %0 = vector.load %arg2[%c0, %c0_0, %c0_1] : memref<32x16x16xbf16, #tpu.memory_space<vmem>>, vector<32x16x16xbf16>
    %c0_2 = arith.constant 0 : index
    %c0_3 = arith.constant 0 : index
    %c0_4 = arith.constant 0 : index
    %1 = vector.load %arg3[%c0_2, %c0_3, %c0_4] : memref<32x16x16xbf16, #tpu.memory_space<vmem>>, vector<32x16x16xbf16>
    "tpu.trace_start"() <{level = 10 : i32, message = "bqd,bkd->bqk"}> : () -> ()
    %cst = arith.constant dense<0.000000e+00> : vector<32x16x16xf32>
    %2 = tpu.matmul %0, %1, %cst {dimension_numbers = #tpu.dot_dimension_numbers<[2], [2], [1], [1], [0, 0, 0, 1, 1, 1], [0], [0]>} : vector<32x16x16xbf16>, vector<32x16x16xbf16>, vector<32x16x16xf32> -> vector<32x16x16xf32>
    "tpu.trace_stop"() : () -> ()
    %c16_i32 = arith.constant 16 : i32
    %3 = arith.muli %arg1, %c16_i32 : i32
    %4 = tpu.iota {dimensions = array<i32: 0>} : vector<16x16xi32>
    %5 = vector.broadcast %3 : i32 to vector<16x16xi32>
    %6 = arith.addi %4, %5 : vector<16x16xi32>
    %7 = tpu.iota {dimensions = array<i32: 1>} : vector<16x16xi32>
    %8 = arith.cmpi sle, %7, %6 : vector<16x16xi32>
    %cst_5 = arith.constant 0.000000e+00 : f32
    %cst_6 = arith.constant -1.000000e+09 : f32
    %9 = vector.broadcast %cst_5 : f32 to vector<16x16xf32>
    %10 = vector.broadcast %cst_6 : f32 to vector<16x16xf32>
    %11 = arith.select %8, %9, %10 : vector<16x16xi1>, vector<16x16xf32>
    %12 = vector.shape_cast %11 : vector<16x16xf32> to vector<1x16x16xf32>
    %13 = vector.broadcast %12 : vector<1x16x16xf32> to vector<32x16x16xf32>
    %14 = arith.addf %2, %13 : vector<32x16x16xf32>
    %cst_7 = arith.constant dense<0xFF800000> : vector<32x16xf32>
    %15 = vector.multi_reduction <maximumf>, %14, %cst_7 [2] : vector<32x16x16xf32> to vector<32x16xf32>
    %16 = vector.shape_cast %15 : vector<32x16xf32> to vector<32x16x1xf32>
    %17 = vector.broadcast %16 : vector<32x16x1xf32> to vector<32x16x16xf32>
    %18 = arith.subf %14, %17 : vector<32x16x16xf32>
    %19 = math.exp %18 : vector<32x16x16xf32>
    %cst_8 = arith.constant dense<0.000000e+00> : vector<32x16xf32>
    %20 = vector.multi_reduction <add>, %19, %cst_8 [2] : vector<32x16x16xf32> to vector<32x16xf32>
    %21 = vector.shape_cast %20 : vector<32x16xf32> to vector<32x16x1xf32>
    %22 = tpu.reciprocal %21 {approx = true} : vector<32x16x1xf32> -> vector<32x16x1xf32>
    %23 = vector.broadcast %22 : vector<32x16x1xf32> to vector<32x16x16xf32>
    %24 = arith.mulf %19, %23 : vector<32x16x16xf32>
    %25 = arith.truncf %24 : vector<32x16x16xf32> to vector<32x16x16xbf16>
    %c0_9 = arith.constant 0 : index
    %c0_10 = arith.constant 0 : index
    %c0_11 = arith.constant 0 : index
    %26 = vector.load %arg4[%c0_9, %c0_10, %c0_11] : memref<32x16x16xbf16, #tpu.memory_space<vmem>>, vector<32x16x16xbf16>
    "tpu.trace_start"() <{level = 10 : i32, message = "bqk,bkd->bqd"}> : () -> ()
    %cst_12 = arith.constant dense<0.000000e+00> : vector<32x16x16xf32>
    %27 = tpu.matmul %25, %26, %cst_12 {dimension_numbers = #tpu.dot_dimension_numbers<[2], [1], [1], [2], [0, 0, 0, 1, 1, 2], [0], [0]>} : vector<32x16x16xbf16>, vector<32x16x16xbf16>, vector<32x16x16xf32> -> vector<32x16x16xf32>
    "tpu.trace_stop"() : () -> ()
    %28 = arith.truncf %27 : vector<32x16x16xf32> to vector<32x16x16xbf16>
    %c0_13 = arith.constant 0 : index
    %c0_14 = arith.constant 0 : index
    %c0_15 = arith.constant 0 : index
    %29 = vector.load %arg5[%c0_13, %c0_14, %c0_15] : memref<32x16x16xbf16, #tpu.memory_space<vmem>>, vector<32x16x16xbf16>
    tpu.vector_store %arg5[%c0_13, %c0_14, %c0_15], %28 {strides = array<i32>} : memref<32x16x16xbf16, #tpu.memory_space<vmem>>, vector<32x16x16xbf16>,
    return
  }
  func.func @transform_0(%arg0: i32, %arg1: i32) -> (i32, i32, i32) {
    %c0_i32 = arith.constant 0 : i32
    %c0_i32_0 = arith.constant 0 : i32
    return %arg0, %arg1, %c0_i32 : i32, i32, i32
  }
  func.func @transform_1(%arg0: i32, %arg1: i32) -> (i32, i32, i32) {
    %c0_i32 = arith.constant 0 : i32
    %c0_i32_0 = arith.constant 0 : i32
    %c0_i32_1 = arith.constant 0 : i32
    return %arg0, %c0_i32, %c0_i32_0 : i32, i32, i32
  }
  func.func @transform_2(%arg0: i32, %arg1: i32) -> (i32, i32, i32) {
    %c0_i32 = arith.constant 0 : i32
    %c0_i32_0 = arith.constant 0 : i32
    %c0_i32_1 = arith.constant 0 : i32
    return %arg0, %c0_i32, %c0_i32_0 : i32, i32, i32
  }
  func.func @transform_3(%arg0: i32, %arg1: i32) -> (i32, i32, i32) {
    %c0_i32 = arith.constant 0 : i32
    %c0_i32_0 = arith.constant 0 : i32
    return %arg0, %arg1, %c0_i32 : i32, i32, i32
  }
}

</mosaic_0001>

<bundles_post_ra>
// kernel: tpu_custom_call.1
= control target key start
LH: loop header
LB: loop body
LE: loop exit
PB: predicated region body
PF: predicated region fallthrough
CT: control target
= control target key end

     0   :  { %vm166_vm0 = vcmask 130048   ;;  %v7428_v0 = vmov 0.0   ;;  %vm5862_vm1 = vmmov 0   ;;  %vm4637_vm4 = vcmask 125952   ;;  %s7424_s1 = inlined_call_operand.vmem [shape: bf16[32,16,16], index: 1, kind: input, shape index: {}]   ;;  %s7425_s0 = inlined_call_operand.vmem [shape: bf16[32,16,16], index: 0, kind: input, shape index: {}]   ;;  %s7426_s2 = inlined_call_operand.vmem [shape: bf16[32,16,16], index: 2, kind: input, shape index: {}]   ;;  %s7427_s3 = inlined_call_operand.vmem [shape: bf16[32,16,16], index: 3, kind: output, shape index: {}]  }
   0x1   :  { %5122 = vmatprep.subr.bf16.mxu0 %v7428_v0  ;;  %5128 = vmatprep.subr.bf16.mxu1 %v7428_v0  ;;  %v5509_v1 = vld [vmem:[%s7424_s1] sm:$0xff]   ;;  %v5510_v2 = vld [vmem:[%s7424_s1 + $0x8] sm:$0xff]   ;;  %v5513_v5 = vld [vmem:[%s7424_s1 + $0x10] sm:$0xff]  }
   0x2   :  { %5124 = vmatprep.mubr.msk.bf16.mxu0 %vm5862_vm1, %v7428_v0  ;;  %5130 = vmatprep.mubr.msk.bf16.mxu1 %vm5862_vm1, %v7428_v0  ;;  %v171_v3 = vsel %vm166_vm0, %v5509_v1, 0  ;;  %v228_v4 = vsel %vm166_vm0, %v5510_v2, 0  ;;  %v5514_v6 = vld [vmem:[%s7424_s1 + $0x18] sm:$0xff]   ;;  %v5511_v7 = vld [vmem:[%s7425_s0] sm:$0xff]   ;;  %v5512_v8 = vld [vmem:[%s7425_s0 + $0x8] sm:$0xff]   ;;  %v285_v9 = vsel %vm166_vm0, %v5513_v5, 0 }
   0x3   :  { %5123 = vmatpush3.bf16.xpose.msra.mxu0 %v171_v3  ;;  %5129 = vmatpush3.bf16.xpose.msra.mxu1 %v228_v4  ;;  %v342_v10 = vsel %vm166_vm0, %v5514_v6, 0  ;;  %v5516_v11 = vld [vmem:[%s7424_s1 + $0x20] sm:$0xff]   ;;  %v5518_v12 = vld [vmem:[%s7424_s1 + $0x28] sm:$0xff]   ;;  %v5515_v13 = vld [vmem:[%s7425_s0 + $0x10] sm:$0xff]  }
   0x4   :  { %5134 = vmatprep.subr.bf16.mxu0 %v7428_v0  ;;  %5140 = vmatprep.subr.bf16.mxu1 %v7428_v0  ;;  %v5517_v14 = vld [vmem:[%s7425_s0 + $0x18] sm:$0xff]   ;;  %v399_v15 = vsel %vm166_vm0, %v5516_v11, 0  ;;  %v456_v16 = vsel %vm166_vm0, %v5518_v12, 0  ;;  %v5520_v17 = vld [vmem:[%s7424_s1 + $0x30] sm:$0xff]   ;;  %v5519_v19 = vld [vmem:[%s7425_s0 + $0x20] sm:$0xff]  }
   0x5   :  { %v5522_v18 = vld [vmem:[%s7424_s1 + $0x38] sm:$0xff]   ;;  %v5521_v20 = vld [vmem:[%s7425_s0 + $0x28] sm:$0xff]   ;;  %v513_v21 = vsel %vm166_vm0, %v5520_v17, 0  ;;  %v5524_v23 = vld [vmem:[%s7424_s1 + $0x40] sm:$0xff]  }
   0x6   :  { %v570_v22 = vsel %vm166_vm0, %v5522_v18, 0  ;;  %v5526_v24 = vld [vmem:[%s7424_s1 + $0x48] sm:$0xff]   ;;  %v5523_v25 = vld [vmem:[%s7425_s0 + $0x30] sm:$0xff]   ;;  %v5525_v26 = vld [vmem:[%s7425_s0 + $0x38] sm:$0xff]   ;;  %v627_v27 = vsel %vm166_vm0, %v5524_v23, 0 }
   0x7   :  { %v684_v28 = vsel %vm166_vm0, %v5526_v24, 0  ;;  %v5528_v29 = vld [vmem:[%s7424_s1 + $0x50] sm:$0xff]   ;;  %v5530_v30 = vld [vmem:[%s7424_s1 + $0x58] sm:$0xff]   ;;  %v5527_v31 = vld [vmem:[%s7425_s0 + $0x40] sm:$0xff]  }
   0x8   :  { %v5529_v32 = vld [vmem:[%s7425_s0 + $0x48] sm:$0xff]   ;;  %v741_v33 = vsel %vm166_vm0, %v5528_v29, 0  ;;  %v798_v34 = vsel %vm166_vm0, %v5530_v30, 0  ;;  %v5532_v35 = vld [vmem:[%s7424_s1 + $0x60] sm:$0xff]   ;;  %v5531_v37 = vld [vmem:[%s7425_s0 + $0x50] sm:$0xff]  }
   0x9   :  { %v5534_v36 = vld [vmem:[%s7424_s1 + $0x68] sm:$0xff]   ;;  %v5533_v38 = vld [vmem:[%s7425_s0 + $0x58] sm:$0xff]   ;;  %v855_v39 = vsel %vm166_vm0, %v5532_v35, 0  ;;  %v5536_v41 = vld [vmem:[%s7424_s1 + $0x70] sm:$0xff]  }
   0xa   :  { %5125 = vmatmul.mubr.msk.bf16.vlgmr.msra.gmra.mrb[0].mxu0 %vm166_vm0, %v5511_v7  ;;  %5131 = vmatmul.mubr.msk.bf16.vlgmr.msra.gmra.mrb[0].mxu1 %vm166_vm0, %v5512_v8  ;;  %v912_v40 = vsel %vm166_vm0, %v5534_v36, 0  ;;  %v5538_v42 = vld [vmem:[%s7424_s1 + $0x78] sm:$0xff]   ;;  %v5535_v43 = vld [vmem:[%s7425_s0 + $0x60] sm:$0xff]   ;;  %v5537_v44 = vld [vmem:[%s7425_s0 + $0x68] sm:$0xff]   ;;  %v969_v45 = vsel %vm166_vm0, %v5536_v41, 0 }
   0xb   :  { %5135 = vmatpush3.bf16.xpose.msra.mxu0 %v285_v9  ;;  %5141 = vmatpush3.bf16.xpose.msra.mxu1 %v342_v10  ;;  %v1026_v46 = vsel %vm166_vm0, %v5538_v42, 0  ;;  %v5540_v47 = vld [vmem:[%s7424_s1 + $0x80] sm:$0xff]   ;;  %v5542_v48 = vld [vmem:[%s7424_s1 + $0x88] sm:$0xff]   ;;  %v5539_v49 = vld [vmem:[%s7425_s0 + $0x70] sm:$0xff]  }
   0xc   :  { %5136 = vmatprep.mubr.msk.bf16.mxu0 %vm5862_vm1, %v7428_v0  ;;  %5146 = vmatprep.subr.bf16.mxu0 %v7428_v0  ;;  %v5541_v50 = vld [vmem:[%s7425_s0 + $0x78] sm:$0xff]   ;;  %v1083_v51 = vsel %vm166_vm0, %v5540_v47, 0  ;;  %v1140_v52 = vsel %vm166_vm0, %v5542_v48, 0  ;;  %v5544_v53 = vld [vmem:[%s7424_s1 + $0x90] sm:$0xff]   ;;  %v5543_v55 = vld [vmem:[%s7425_s0 + $0x80] sm:$0xff]  }
   0xd   :  { %5142 = vmatprep.mubr.msk.bf16.mxu1 %vm5862_vm1, %v7428_v0  ;;  %5152 = vmatprep.subr.bf16.mxu1 %v7428_v0  ;;  %v5546_v54 = vld [vmem:[%s7424_s1 + $0x98] sm:$0xff]   ;;  %v5545_v56 = vld [vmem:[%s7425_s0 + $0x88] sm:$0xff]   ;;  %v1197_v57 = vsel %vm166_vm0, %v5544_v53, 0  ;;  %v5548_v59 = vld [vmem:[%s7424_s1 + $0xa0] sm:$0xff]  }
   0xe   :  { %v1254_v58 = vsel %vm166_vm0, %v5546_v54, 0  ;;  %v5550_v60 = vld [vmem:[%s7424_s1 + $0xa8] sm:$0xff]   ;;  %v5547_v61 = vld [vmem:[%s7425_s0 + $0x90] sm:$0xff]   ;;  %v5549_v62 = vld [vmem:[%s7425_s0 + $0x98] sm:$0xff]   ;;  %v1311_v63 = vsel %vm166_vm0, %v5548_v59, 0 }
   0xf   :  { %v1368_v1 = vsel %vm166_vm0, %v5550_v60, 0  ;;  %v5552_v2 = vld [vmem:[%s7424_s1 + $0xb0] sm:$0xff]   ;;  %v5554_v3 = vld [vmem:[%s7424_s1 + $0xb8] sm:$0xff]   ;;  %v5551_v4 = vld [vmem:[%s7425_s0 + $0xa0] sm:$0xff]  }
  0x10   :  { %v5553_v5 = vld [vmem:[%s7425_s0 + $0xa8] sm:$0xff]   ;;  %v1425_v6 = vsel %vm166_vm0, %v5552_v2, 0  ;;  %v1482_v7 = vsel %vm166_vm0, %v5554_v3, 0  ;;  %v5556_v8 = vld [vmem:[%s7424_s1 + $0xc0] sm:$0xff]   ;;  %v5555_v10 = vld [vmem:[%s7425_s0 + $0xb0] sm:$0xff]  }
  0x11   :  { %v5558_v9 = vld [vmem:[%s7424_s1 + $0xc8] sm:$0xff]   ;;  %v5557_v11 = vld [vmem:[%s7425_s0 + $0xb8] sm:$0xff]   ;;  %v1539_v12 = vsel %vm166_vm0, %v5556_v8, 0 }
  0x12   :  { %5137 = vmatmul.mubr.msk.bf16.vlgmr.msra.gmra.mrb[4].mxu0 %vm166_vm0, %v5515_v13  ;;  %5143 = vmatmul.mubr.msk.bf16.vlgmr.msra.gmra.mrb[4].mxu1 %vm166_vm0, %v5517_v14  ;;  %v1596_v13 = vsel %vm166_vm0, %v5558_v9, 0  ;;  %v5560_v14 = vld [vmem:[%s7424_s1 + $0xd0] sm:$0xff]   ;;  %v5561_v17 = vld [vmem:[%s7425_s0 + $0xc8] sm:$0xff]   ;;  %v5565_v23 = vld [vmem:[%s7425_s0 + $0xd8] sm:$0xff]  }
  0x13   :  { %5147 = vmatpush3.bf16.xpose.msra.mxu0 %v399_v15  ;;  %5153 = vmatpush3.bf16.xpose.msra.mxu1 %v456_v16  ;;  %v5562_v15 = vld [vmem:[%s7424_s1 + $0xd8] sm:$0xff]   ;;  %v5559_v16 = vld [vmem:[%s7425_s0 + $0xc0] sm:$0xff]   ;;  %v1653_v18 = vsel %vm166_vm0, %v5560_v14, 0  ;;  %v5569_v29 = vld [vmem:[%s7425_s0 + $0xe8] sm:$0xff]  }
  0x14   :  { %5148 = vmatprep.mubr.msk.bf16.mxu0 %vm5862_vm1, %v7428_v0  ;;  %5158 = vmatprep.subr.bf16.mxu0 %v7428_v0 }
  0x15   :  { %5154 = vmatprep.mubr.msk.bf16.mxu1 %vm5862_vm1, %v7428_v0  ;;  %5164 = vmatprep.subr.bf16.mxu1 %v7428_v0 }
  0x1a   :  { %5149 = vmatmul.mubr.msk.bf16.vlgmr.msra.gmra.mrb[8].mxu0 %vm166_vm0, %v5519_v19  ;;  %5155 = vmatmul.mubr.msk.bf16.vlgmr.msra.gmra.mrb[8].mxu1 %vm166_vm0, %v5521_v20  ;;  %v1710_v19 = vsel %vm166_vm0, %v5562_v15, 0  ;;  %v5564_v20 = vld [vmem:[%s7424_s1 + $0xe0] sm:$0xff]  }
  0x1b   :  { %5159 = vmatpush3.bf16.xpose.msra.mxu0 %v513_v21  ;;  %5165 = vmatpush3.bf16.xpose.msra.mxu1 %v570_v22  ;;  %v5566_v21 = vld [vmem:[%s7424_s1 + $0xe8] sm:$0xff]   ;;  %v5563_v22 = vld [vmem:[%s7425_s0 + $0xd0] sm:$0xff]   ;;  %v1767_v24 = vsel %vm166_vm0, %v5564_v20, 0 }
  0x1c   :  { %5160 = vmatprep.mubr.msk.bf16.mxu0 %vm5862_vm1, %v7428_v0  ;;  %5170 = vmatprep.subr.bf16.mxu0 %v7428_v0 }
  0x1d   :  { %5166 = vmatprep.mubr.msk.bf16.mxu1 %vm5862_vm1, %v7428_v0  ;;  %5176 = vmatprep.subr.bf16.mxu1 %v7428_v0 }
  0x22   :  { %5161 = vmatmul.mubr.msk.bf16.vlgmr.msra.gmra.mrb[12].mxu0 %vm166_vm0, %v5523_v25  ;;  %5167 = vmatmul.mubr.msk.bf16.vlgmr.msra.gmra.mrb[12].mxu1 %vm166_vm0, %v5525_v26  ;;  %v1824_v25 = vsel %vm166_vm0, %v5566_v21, 0  ;;  %v5568_v26 = vld [vmem:[%s7424_s1 + $0xf0] sm:$0xff]  }
  0x23   :  { %5171 = vmatpush3.bf16.xpose.msra.mxu0 %v627_v27  ;;  %5177 = vmatpush3.bf16.xpose.msra.mxu1 %v684_v28  ;;  %v5570_v27 = vld [vmem:[%s7424_s1 + $0xf8] sm:$0xff]   ;;  %v5567_v28 = vld [vmem:[%s7425_s0 + $0xe0] sm:$0xff]   ;;  %v1881_v30 = vsel %vm166_vm0, %v5568_v26, 0 }
  0x24   :  { %5172 = vmatprep.mubr.msk.bf16.mxu0 %vm5862_vm1, %v7428_v0  ;;  %5182 = vmatprep.subr.bf16.mxu0 %v7428_v0 }
  0x25   :  { %5178 = vmatprep.mubr.msk.bf16.mxu1 %vm5862_vm1, %v7428_v0  ;;  %5188 = vmatprep.subr.bf16.mxu1 %v7428_v0 }
  0x2a   :  { %5173 = vmatmul.mubr.msk.bf16.vlgmr.msra.gmra.mrb[16].mxu0 %vm166_vm0, %v5527_v31  ;;  %5179 = vmatmul.mubr.msk.bf16.vlgmr.msra.gmra.mrb[16].mxu1 %vm166_vm0, %v5529_v32  ;;  %v1938_v31 = vsel %vm166_vm0, %v5570_v27, 0  ;;  %v5571_v32 = vld [vmem:[%s7425_s0 + $0xf0] sm:$0xff]  }
  0x2b   :  { %5183 = vmatpush3.bf16.xpose.msra.mxu0 %v741_v33  ;;  %5189 = vmatpush3.bf16.xpose.msra.mxu1 %v798_v34  ;;  %v5572_v33 = vld [vmem:[%s7425_s0 + $0xf8] sm:$0xff]   ;;  %v144_v34 = vlaneseq }
  0x2c   :  { %5184 = vmatprep.mubr.msk.bf16.mxu0 %vm5862_vm1, %v7428_v0  ;;  %5194 = vmatprep.subr.bf16.mxu0 %v7428_v0 }
  0x2d   :  { %5190 = vmatprep.mubr.msk.bf16.mxu1 %vm5862_vm1, %v7428_v0  ;;  %5200 = vmatprep.subr.bf16.mxu1 %v7428_v0  ;;  %v145_v35 = vshrl.u32 %v144_v34, 7  ;;  %v151_v36 = vand.u32 127, %v144_v34 }
  0x2f   :  { %vm152_vm2 = vcmp.le.s32.totalorder %v151_v36, %v145_v35 }
  0x32   :  { %5185 = vmatmul.mubr.msk.bf16.vlgmr.msra.gmra.mrb[20].mxu0 %vm166_vm0, %v5531_v37  ;;  %5191 = vmatmul.mubr.msk.bf16.vlgmr.msra.gmra.mrb[20].mxu1 %vm166_vm0, %v5533_v38  ;;  %v146_v37 = vadd.s32 8, %v145_v35  ;;  %v5863_v38 = vmov -1e+09  }
  0x33   :  { %5195 = vmatpush3.bf16.xpose.msra.mxu0 %v855_v39  ;;  %5201 = vmatpush3.bf16.xpose.msra.mxu1 %v912_v40  ;;  %v6242_v39 = vsel %vm152_vm2, 0.0, %v5863_v38 }
  0x34   :  { %5196 = vmatprep.mubr.msk.bf16.mxu0 %vm5862_vm1, %v7428_v0  ;;  %5206 = vmatprep.subr.bf16.mxu0 %v7428_v0  ;;  %vm153_vm3 = vcmp.le.s32.totalorder %v151_v36, %v146_v37 }
  0x35   :  { %5202 = vmatprep.mubr.msk.bf16.mxu1 %vm5862_vm1, %v7428_v0  ;;  %5212 = vmatprep.subr.bf16.mxu1 %v7428_v0  ;;  %v6244_v41 = vsel %vm153_vm3, 0.0, %v5863_v38 }
  0x3a   :  { %5197 = vmatmul.mubr.msk.bf16.vlgmr.msra.gmra.mrb[24].mxu0 %vm166_vm0, %v5535_v43  ;;  %5203 = vmatmul.mubr.msk.bf16.vlgmr.msra.gmra.mrb[24].mxu1 %vm166_vm0, %v5537_v44 }
  0x3b   :  { %5207 = vmatpush3.bf16.xpose.msra.mxu0 %v969_v45  ;;  %5213 = vmatpush3.bf16.xpose.msra.mxu1 %v1026_v46 }
  0x3c   :  { %5208 = vmatprep.mubr.msk.bf16.mxu0 %vm5862_vm1, %v7428_v0  ;;  %5218 = vmatprep.subr.bf16.mxu0 %v7428_v0 }
  0x3d   :  { %5214 = vmatprep.mubr.msk.bf16.mxu1 %vm5862_vm1, %v7428_v0  ;;  %5224 = vmatprep.subr.bf16.mxu1 %v7428_v0 }
  0x42   :  { %5209 = vmatmul.mubr.msk.bf16.vlgmr.msra.gmra.mrb[28].mxu0 %vm166_vm0, %v5539_v49  ;;  %5215 = vmatmul.mubr.msk.bf16.vlgmr.msra.gmra.mrb[28].mxu1 %vm166_vm0, %v5541_v50 }
  0x43   :  { %5219 = vmatpush3.bf16.xpose.msra.mxu0 %v1083_v51  ;;  %5225 = vmatpush3.bf16.xpose.msra.mxu1 %v1140_v52 }
  0x44   :  { %5220 = vmatprep.mubr.msk.bf16.mxu0 %vm5862_vm1, %v7428_v0  ;;  %5230 = vmatprep.subr.bf16.mxu0 %v7428_v0 }
  0x45   :  { %5226 = vmatprep.mubr.msk.bf16.mxu1 %vm5862_vm1, %v7428_v0  ;;  %5236 = vmatprep.subr.bf16.mxu1 %v7428_v0 }
  0x4a   :  { %5221 = vmatmul.mubr.msk.bf16.vlgmr.msra.gmra.mrb[32].mxu0 %vm166_vm0, %v5543_v55  ;;  %5227 = vmatmul.mubr.msk.bf16.vlgmr.msra.gmra.mrb[32].mxu1 %vm166_vm0, %v5545_v56 }
  0x4b   :  { %5231 = vmatpush3.bf16.xpose.msra.mxu0 %v1197_v57  ;;  %5237 = vmatpush3.bf16.xpose.msra.mxu1 %v1254_v58 }
  0x4c   :  { %5232 = vmatprep.mubr.msk.bf16.mxu0 %vm5862_vm1, %v7428_v0  ;;  %5242 = vmatprep.subr.bf16.mxu0 %v7428_v0 }
  0x4d   :  { %5238 = vmatprep.mubr.msk.bf16.mxu1 %vm5862_vm1, %v7428_v0  ;;  %5248 = vmatprep.subr.bf16.mxu1 %v7428_v0 }
  0x52   :  { %5233 = vmatmul.mubr.msk.bf16.vlgmr.msra.gmra.mrb[36].mxu0 %vm166_vm0, %v5547_v61  ;;  %5239 = vmatmul.mubr.msk.bf16.vlgmr.msra.gmra.mrb[36].mxu1 %vm166_vm0, %v5549_v62 }
  0x53   :  { %5243 = vmatpush3.bf16.xpose.msra.mxu0 %v1311_v63  ;;  %5249 = vmatpush3.bf16.xpose.msra.mxu1 %v1368_v1 }
  0x54   :  { %5244 = vmatprep.mubr.msk.bf16.mxu0 %vm5862_vm1, %v7428_v0  ;;  %5254 = vmatprep.subr.bf16.mxu0 %v7428_v0 }
  0x55   :  { %5250 = vmatprep.mubr.msk.bf16.mxu1 %vm5862_vm1, %v7428_v0  ;;  %5260 = vmatprep.subr.bf16.mxu1 %v7428_v0 }
  0x5a   :  { %5245 = vmatmul.mubr.msk.bf16.vlgmr.msra.gmra.mrb[40].mxu0 %vm166_vm0, %v5551_v4  ;;  %5251 = vmatmul.mubr.msk.bf16.vlgmr.msra.gmra.mrb[40].mxu1 %vm166_vm0, %v5553_v5 }
  0x5b   :  { %5255 = vmatpush3.bf16.xpose.msra.mxu0 %v1425_v6  ;;  %5261 = vmatpush3.bf16.xpose.msra.mxu1 %v1482_v7 }
  0x5c   :  { %5256 = vmatprep.mubr.msk.bf16.mxu0 %vm5862_vm1, %v7428_v0  ;;  %5266 = vmatprep.subr.bf16.mxu0 %v7428_v0 }
  0x5d   :  { %5262 = vmatprep.mubr.msk.bf16.mxu1 %vm5862_vm1, %v7428_v0  ;;  %5272 = vmatprep.subr.bf16.mxu1 %v7428_v0 }
  0x62   :  { %5257 = vmatmul.mubr.msk.bf16.vlgmr.msra.gmra.mrb[44].mxu0 %vm166_vm0, %v5555_v10  ;;  %5263 = vmatmul.mubr.msk.bf16.vlgmr.msra.gmra.mrb[44].mxu1 %vm166_vm0, %v5557_v11 }
  0x63   :  { %5267 = vmatpush3.bf16.xpose.msra.mxu0 %v1539_v12  ;;  %5273 = vmatpush3.bf16.xpose.msra.mxu1 %v1596_v13 }
  0x64   :  { %5268 = vmatprep.mubr.msk.bf16.mxu0 %vm5862_vm1, %v7428_v0  ;;  %5278 = vmatprep.subr.bf16.mxu0 %v7428_v0 }
  0x65   :  { %5274 = vmatprep.mubr.msk.bf16.mxu1 %vm5862_vm1, %v7428_v0  ;;  %5284 = vmatprep.subr.bf16.mxu1 %v7428_v0 }
  0x6a   :  { %5269 = vmatmul.mubr.msk.bf16.vlgmr.msra.gmra.mrb[48].mxu0 %vm166_vm0, %v5559_v16  ;;  %5275 = vmatmul.mubr.msk.bf16.vlgmr.msra.gmra.mrb[48].mxu1 %vm166_vm0, %v5561_v17 }
  0x6b   :  { %5279 = vmatpush3.bf16.xpose.msra.mxu0 %v1653_v18  ;;  %5285 = vmatpush3.bf16.xpose.msra.mxu1 %v1710_v19 }
  0x6c   :  { %5280 = vmatprep.mubr.msk.bf16.mxu0 %vm5862_vm1, %v7428_v0  ;;  %5290 = vmatprep.subr.bf16.mxu0 %v7428_v0 }
  0x6d   :  { %5286 = vmatprep.mubr.msk.bf16.mxu1 %vm5862_vm1, %v7428_v0  ;;  %5296 = vmatprep.subr.bf16.mxu1 %v7428_v0 }
  0x72   :  { %5281 = vmatmul.mubr.msk.bf16.vlgmr.msra.gmra.mrb[52].mxu0 %vm166_vm0, %v5563_v22  ;;  %5287 = vmatmul.mubr.msk.bf16.vlgmr.msra.gmra.mrb[52].mxu1 %vm166_vm0, %v5565_v23 }
  0x73   :  { %5291 = vmatpush3.bf16.xpose.msra.mxu0 %v1767_v24  ;;  %5297 = vmatpush3.bf16.xpose.msra.mxu1 %v1824_v25 }
  0x74   :  { %5292 = vmatprep.mubr.msk.bf16.mxu0 %vm5862_vm1, %v7428_v0  ;;  %5302 = vmatprep.subr.bf16.mxu0 %v7428_v0 }
  0x75   :  { %5298 = vmatprep.mubr.msk.bf16.mxu1 %vm5862_vm1, %v7428_v0  ;;  %5308 = vmatprep.subr.bf16.mxu1 %v7428_v0 }
  0x7a   :  { %5293 = vmatmul.mubr.msk.bf16.vlgmr.msra.gmra.mrb[56].mxu0 %vm166_vm0, %v5567_v28  ;;  %5299 = vmatmul.mubr.msk.bf16.vlgmr.msra.gmra.mrb[56].mxu1 %vm166_vm0, %v5569_v29 }
  0x7b   :  { %5303 = vmatpush3.bf16.xpose.msra.mxu0 %v1881_v30  ;;  %5309 = vmatpush3.bf16.xpose.msra.mxu1 %v1938_v31 }
  0x7c   :  { %5304 = vmatprep.mubr.msk.bf16.mxu0 %vm5862_vm1, %v7428_v0  ;;  %5310 = vmatprep.mubr.msk.bf16.mxu1 %vm5862_vm1, %v7428_v0 }
  0x7d   :  { %5314 = vmatprep.subr.bf16.mxu0 %v7428_v0  ;;  %5320 = vmatprep.subr.bf16.mxu1 %v7428_v0 }
  0x82   :  { %5305 = vmatmul.mubr.msk.bf16.vlgmr.msra.gmra.mrb[60].mxu0 %vm166_vm0, %v5571_v32  ;;  %5311 = vmatmul.mubr.msk.bf16.vlgmr.msra.gmra.mrb[60].mxu1 %vm166_vm0, %v5572_v33 }
  0x83   :  { %5316 = vmatprep.mubr.msk.bf16.mxu0 %vm5862_vm1, %v7428_v0  ;;  %5322 = vmatprep.mubr.msk.bf16.mxu1 %vm5862_vm1, %v7428_v0 }
  0xdd   :  { %v207_v40 = vpop.f32.mrb[0].mxu0  ;;  %v264_v43 = vpop.f32.mrb[0].mxu1 }
  0xde   :  { %v6247_v42 = vadd.f32 %v207_v40, %v6242_v39  ;;  %v5126_v44 = vpop.f32.mrb[1].mxu0  ;;  %v6250_v45 = vadd.f32 %v264_v43, %v6242_v39  ;;  %v5132_v47 = vpop.f32.mrb[1].mxu1 }
  0xdf   :  { %v210_v46 = vpop.f32.mrb[2].mxu0  ;;  %v267_v50 = vpop.f32.mrb[2].mxu1 }
  0xe0   :  { %v6253_v48 = vadd.f32 %v210_v46, %v6244_v41  ;;  %v5127_v49 = vpop.f32.mrb[3].mxu0  ;;  %v1981_v51 = vsel %vm166_vm0, %v6247_v42, -inf  ;;  %v6258_v52 = vadd.f32 %v267_v50, %v6244_v41  ;;  %v1987_v53 = vsel %vm166_vm0, %v6250_v45, -inf  ;;  %v5133_v54 = vpop.f32.mrb[3].mxu1 }
  0xe1   :  { %1982 = vmax.xlane.f32.xlu0 %v1981_v51  ;;  %1988 = vmax.xlane.f32.xlu1 %v1987_v53 }
  0xe2   :  { %v1990_v55 = vsel %vm166_vm0, %v6258_v52, -inf  ;;  %v1984_v56 = vsel %vm166_vm0, %v6253_v48, -inf }
  0xe5   :  { %1985 = vmax.xlane.f32.xlu0 %v1984_v56  ;;  %v321_v57 = vpop.f32.mrb[4].mxu0  ;;  %1991 = vmax.xlane.f32.xlu1 %v1990_v55  ;;  %v378_v60 = vpop.f32.mrb[4].mxu1 }
  0xe6   :  { %v6267_v58 = vadd.f32 %v321_v57, %v6242_v39  ;;  %v5138_v59 = vpop.f32.mrb[5].mxu0  ;;  %v6270_v62 = vadd.f32 %v378_v60, %v6242_v39  ;;  %v5144_v63 = vpop.f32.mrb[5].mxu1 }
  0xe7   :  { %v324_v61 = vpop.f32.mrb[6].mxu0  ;;  %v381_v4 = vpop.f32.mrb[6].mxu1 }
  0xe8   :  { %v6273_v1 = vadd.f32 %v324_v61, %v6244_v41  ;;  %v5139_v2 = vpop.f32.mrb[7].mxu0  ;;  %v1993_v3 = vsel %vm166_vm0, %v6267_v58, -inf  ;;  %v6278_v5 = vadd.f32 %v381_v4, %v6244_v41  ;;  %v5145_v6 = vpop.f32.mrb[7].mxu1  ;;  %v1999_v8 = vsel %vm166_vm0, %v6270_v62, -inf }
  0xe9   :  { %1994 = vmax.xlane.f32.xlu0 %v1993_v3 }
  0xea   :  { %v1996_v7 = vsel %vm166_vm0, %v6273_v1, -inf  ;;  %v2002_v9 = vsel %vm166_vm0, %v6278_v5, -inf }
  0xeb   :  { %1997 = vmax.xlane.f32.xlu1 %v1996_v7 }
  0xed   :  { %2000 = vmax.xlane.f32.xlu0 %v1999_v8  ;;  %v435_v10 = vpop.f32.mrb[8].mxu0  ;;  %v492_v13 = vpop.f32.mrb[8].mxu1 }
  0xee   :  { %v6287_v11 = vadd.f32 %v435_v10, %v6242_v39  ;;  %v5150_v12 = vpop.f32.mrb[9].mxu0  ;;  %v6290_v15 = vadd.f32 %v492_v13, %v6242_v39  ;;  %v5156_v16 = vpop.f32.mrb[9].mxu1 }
  0xef   :  { %2003 = vmax.xlane.f32.xlu1 %v2002_v9  ;;  %v438_v14 = vpop.f32.mrb[10].mxu0  ;;  %v495_v20 = vpop.f32.mrb[10].mxu1 }
  0xf0   :  { %v6293_v17 = vadd.f32 %v438_v14, %v6244_v41  ;;  %v5151_v18 = vpop.f32.mrb[11].mxu0  ;;  %v2005_v19 = vsel %vm166_vm0, %v6287_v11, -inf  ;;  %v6298_v21 = vadd.f32 %v495_v20, %v6244_v41  ;;  %v5157_v22 = vpop.f32.mrb[11].mxu1  ;;  %v2011_v24 = vsel %vm166_vm0, %v6290_v15, -inf }
  0xf1   :  { %2006 = vmax.xlane.f32.xlu0 %v2005_v19 }
  0xf2   :  { %v2008_v23 = vsel %vm166_vm0, %v6293_v17, -inf  ;;  %v2014_v25 = vsel %vm166_vm0, %v6298_v21, -inf }
  0xf3   :  { %2009 = vmax.xlane.f32.xlu1 %v2008_v23 }
  0xf5   :  { %2012 = vmax.xlane.f32.xlu0 %v2011_v24  ;;  %v549_v26 = vpop.f32.mrb[12].mxu0  ;;  %v606_v29 = vpop.f32.mrb[12].mxu1 }
  0xf6   :  { %v6307_v27 = vadd.f32 %v549_v26, %v6242_v39  ;;  %v5162_v28 = vpop.f32.mrb[13].mxu0  ;;  %v6310_v31 = vadd.f32 %v606_v29, %v6242_v39  ;;  %v5168_v32 = vpop.f32.mrb[13].mxu1 }
  0xf7   :  { %2015 = vmax.xlane.f32.xlu1 %v2014_v25  ;;  %v552_v30 = vpop.f32.mrb[14].mxu0  ;;  %v609_v36 = vpop.f32.mrb[14].mxu1 }
  0xf8   :  { %v6313_v33 = vadd.f32 %v552_v30, %v6244_v41  ;;  %v5163_v34 = vpop.f32.mrb[15].mxu0  ;;  %v2017_v35 = vsel %vm166_vm0, %v6307_v27, -inf  ;;  %v6318_v37 = vadd.f32 %v609_v36, %v6244_v41  ;;  %v5169_v38 = vpop.f32.mrb[15].mxu1  ;;  %v2023_v43 = vsel %vm166_vm0, %v6310_v31, -inf }
  0xf9   :  { %2018 = vmax.xlane.f32.xlu0 %v2017_v35 }
  0xfa   :  { %v2020_v40 = vsel %vm166_vm0, %v6313_v33, -inf  ;;  %v2026_v44 = vsel %vm166_vm0, %v6318_v37, -inf }
  0xfb   :  { %2021 = vmax.xlane.f32.xlu1 %v2020_v40 }
  0xfd   :  { %2024 = vmax.xlane.f32.xlu0 %v2023_v43  ;;  %v663_v46 = vpop.f32.mrb[16].mxu0  ;;  %v720_v50 = vpop.f32.mrb[16].mxu1 }
  0xfe   :  { %v6327_v47 = vadd.f32 %v663_v46, %v6242_v39  ;;  %v5174_v49 = vpop.f32.mrb[17].mxu0  ;;  %v6330_v53 = vadd.f32 %v720_v50, %v6242_v39  ;;  %v5180_v54 = vpop.f32.mrb[17].mxu1 }
  0xff   :  { %2027 = vmax.xlane.f32.xlu1 %v2026_v44  ;;  %v666_v51 = vpop.f32.mrb[18].mxu0  ;;  %v723_v59 = vpop.f32.mrb[18].mxu1 }
 0x100   :  { %v6333_v55 = vadd.f32 %v666_v51, %v6244_v41  ;;  %v5175_v56 = vpop.f32.mrb[19].mxu0  ;;  %v2029_v57 = vsel %vm166_vm0, %v6327_v47, -inf  ;;  %v6338_v60 = vadd.f32 %v723_v59, %v6244_v41  ;;  %v5181_v61 = vpop.f32.mrb[19].mxu1  ;;  %v2035_v2 = vsel %vm166_vm0, %v6330_v53, -inf }
 0x101   :  { %2030 = vmax.xlane.f32.xlu0 %v2029_v57 }
 0x102   :  { %v2032_v63 = vsel %vm166_vm0, %v6333_v55, -inf  ;;  %v2038_v3 = vsel %vm166_vm0, %v6338_v60, -inf }
 0x103   :  { %2033 = vmax.xlane.f32.xlu1 %v2032_v63 }
 0x105   :  { %2036 = vmax.xlane.f32.xlu0 %v2035_v2  ;;  %v777_v4 = vpop.f32.mrb[20].mxu0  ;;  %v834_v8 = vpop.f32.mrb[20].mxu1 }
 0x106   :  { %v6347_v6 = vadd.f32 %v777_v4, %v6242_v39  ;;  %v5186_v7 = vpop.f32.mrb[21].mxu0  ;;  %v6350_v10 = vadd.f32 %v834_v8, %v6242_v39  ;;  %v5192_v12 = vpop.f32.mrb[21].mxu1 }
 0x107   :  { %2039 = vmax.xlane.f32.xlu1 %v2038_v3  ;;  %v780_v9 = vpop.f32.mrb[22].mxu0  ;;  %v837_v18 = vpop.f32.mrb[22].mxu1 }
 0x108   :  { %v6353_v13 = vadd.f32 %v780_v9, %v6244_v41  ;;  %v5187_v14 = vpop.f32.mrb[23].mxu0  ;;  %v2041_v16 = vsel %vm166_vm0, %v6347_v6, -inf  ;;  %v6358_v19 = vadd.f32 %v837_v18, %v6244_v41  ;;  %v5193_v20 = vpop.f32.mrb[23].mxu1  ;;  %v2047_v23 = vsel %vm166_vm0, %v6350_v10, -inf }
 0x109   :  { %2042 = vmax.xlane.f32.xlu0 %v2041_v16 }
 0x10a   :  { %v2044_v22 = vsel %vm166_vm0, %v6353_v13, -inf  ;;  %v2050_v24 = vsel %vm166_vm0, %v6358_v19, -inf }
 0x10b   :  { %2045 = vmax.xlane.f32.xlu1 %v2044_v22 }
 0x10d   :  { %2048 = vmax.xlane.f32.xlu0 %v2047_v23  ;;  %v891_v25 = vpop.f32.mrb[24].mxu0  ;;  %v948_v29 = vpop.f32.mrb[24].mxu1 }
 0x10e   :  { %v6367_v26 = vadd.f32 %v891_v25, %v6242_v39  ;;  %v5198_v28 = vpop.f32.mrb[25].mxu0  ;;  %v6370_v32 = vadd.f32 %v948_v29, %v6242_v39  ;;  %v5204_v34 = vpop.f32.mrb[25].mxu1 }
 0x10f   :  { %2051 = vmax.xlane.f32.xlu1 %v2050_v24  ;;  %v894_v30 = vpop.f32.mrb[26].mxu0  ;;  %v951_v40 = vpop.f32.mrb[26].mxu1 }
 0x110   :  { %v6373_v35 = vadd.f32 %v894_v30, %v6244_v41  ;;  %v5199_v36 = vpop.f32.mrb[27].mxu0  ;;  %v2053_v38 = vsel %vm166_vm0, %v6367_v26, -inf  ;;  %v6378_v43 = vadd.f32 %v951_v40, %v6244_v41  ;;  %v5205_v44 = vpop.f32.mrb[27].mxu1  ;;  %v2059_v49 = vsel %vm166_vm0, %v6370_v32, -inf }
 0x111   :  { %2054 = vmax.xlane.f32.xlu0 %v2053_v38 }
 0x112   :  { %v2056_v46 = vsel %vm166_vm0, %v6373_v35, -inf  ;;  %v2062_v50 = vsel %vm166_vm0, %v6378_v43, -inf }
 0x113   :  { %2057 = vmax.xlane.f32.xlu1 %v2056_v46 }
 0x115   :  { %2060 = vmax.xlane.f32.xlu0 %v2059_v49  ;;  %v1005_v51 = vpop.f32.mrb[28].mxu0  ;;  %v1062_v57 = vpop.f32.mrb[28].mxu1 }
 0x116   :  { %v6387_v54 = vadd.f32 %v1005_v51, %v6242_v39  ;;  %v5210_v56 = vpop.f32.mrb[29].mxu0  ;;  %v6390_v61 = vadd.f32 %v1062_v57, %v6242_v39  ;;  %v5216_v63 = vpop.f32.mrb[29].mxu1 }
 0x117   :  { %2063 = vmax.xlane.f32.xlu1 %v2062_v50  ;;  %v1008_v59 = vpop.f32.mrb[30].mxu0  ;;  %v1065_v7 = vpop.f32.mrb[30].mxu1 }
 0x118   :  { %v6393_v2 = vadd.f32 %v1008_v59, %v6244_v41  ;;  %v5211_v3 = vpop.f32.mrb[31].mxu0  ;;  %v2065_v4 = vsel %vm166_vm0, %v6387_v54, -inf  ;;  %v6398_v8 = vadd.f32 %v1065_v7, %v6244_v41  ;;  %v5217_v9 = vpop.f32.mrb[31].mxu1  ;;  %v2071_v14 = vsel %vm166_vm0, %v6390_v61, -inf }
 0x119   :  { %2066 = vmax.xlane.f32.xlu0 %v2065_v4 }
 0x11a   :  { %v2068_v12 = vsel %vm166_vm0, %v6393_v2, -inf  ;;  %v2074_v16 = vsel %vm166_vm0, %v6398_v8, -inf }
 0x11b   :  { %2069 = vmax.xlane.f32.xlu1 %v2068_v12 }
 0x11d   :  { %2072 = vmax.xlane.f32.xlu0 %v2071_v14  ;;  %v1119_v18 = vpop.f32.mrb[32].mxu0  ;;  %v1176_v23 = vpop.f32.mrb[32].mxu1 }
 0x11e   :  { %v6407_v20 = vadd.f32 %v1119_v18, %v6242_v39  ;;  %v5222_v22 = vpop.f32.mrb[33].mxu0  ;;  %v6410_v25 = vadd.f32 %v1176_v23, %v6242_v39  ;;  %v5228_v28 = vpop.f32.mrb[33].mxu1 }
 0x11f   :  { %2075 = vmax.xlane.f32.xlu1 %v2074_v16  ;;  %v1122_v24 = vpop.f32.mrb[34].mxu0  ;;  %v1179_v36 = vpop.f32.mrb[34].mxu1 }
 0x120   :  { %v6413_v29 = vadd.f32 %v1122_v24, %v6244_v41  ;;  %v5223_v30 = vpop.f32.mrb[35].mxu0  ;;  %v2077_v34 = vsel %vm166_vm0, %v6407_v20, -inf  ;;  %v6418_v38 = vadd.f32 %v1179_v36, %v6244_v41  ;;  %v5229_v40 = vpop.f32.mrb[35].mxu1  ;;  %v2083_v46 = vsel %vm166_vm0, %v6410_v25, -inf }
 0x121   :  { %2078 = vmax.xlane.f32.xlu0 %v2077_v34 }
 0x122   :  { %v2080_v44 = vsel %vm166_vm0, %v6413_v29, -inf  ;;  %v2086_v49 = vsel %vm166_vm0, %v6418_v38, -inf }
 0x123   :  { %2081 = vmax.xlane.f32.xlu1 %v2080_v44 }
 0x125   :  { %2084 = vmax.xlane.f32.xlu0 %v2083_v46  ;;  %v1233_v50 = vpop.f32.mrb[36].mxu0  ;;  %v1290_v57 = vpop.f32.mrb[36].mxu1 }
 0x126   :  { %v6427_v51 = vadd.f32 %v1233_v50, %v6242_v39  ;;  %v5234_v56 = vpop.f32.mrb[37].mxu0  ;;  %v6430_v63 = vadd.f32 %v1290_v57, %v6242_v39  ;;  %v5240_v3 = vpop.f32.mrb[37].mxu1 }
 0x127   :  { %2087 = vmax.xlane.f32.xlu1 %v2086_v49  ;;  %v1236_v59 = vpop.f32.mrb[38].mxu0  ;;  %v1293_v12 = vpop.f32.mrb[38].mxu1 }
 0x128   :  { %v6433_v4 = vadd.f32 %v1236_v59, %v6244_v41  ;;  %v5235_v7 = vpop.f32.mrb[39].mxu0  ;;  %v2089_v9 = vsel %vm166_vm0, %v6427_v51, -inf  ;;  %v6438_v14 = vadd.f32 %v1293_v12, %v6244_v41  ;;  %v5241_v16 = vpop.f32.mrb[39].mxu1  ;;  %v2095_v22 = vsel %vm166_vm0, %v6430_v63, -inf }
 0x129   :  { %2090 = vmax.xlane.f32.xlu0 %v2089_v9 }
 0x12a   :  { %v2092_v18 = vsel %vm166_vm0, %v6433_v4, -inf  ;;  %v2098_v23 = vsel %vm166_vm0, %v6438_v14, -inf }
 0x12b   :  { %2093 = vmax.xlane.f32.xlu1 %v2092_v18 }
 0x12d   :  { %2096 = vmax.xlane.f32.xlu0 %v2095_v22  ;;  %v1347_v24 = vpop.f32.mrb[40].mxu0  ;;  %v1404_v34 = vpop.f32.mrb[40].mxu1 }
 0x12e   :  { %v6447_v28 = vadd.f32 %v1347_v24, %v6242_v39  ;;  %v5246_v30 = vpop.f32.mrb[41].mxu0  ;;  %v6450_v40 = vadd.f32 %v1404_v34, %v6242_v39  ;;  %v5252_v44 = vpop.f32.mrb[41].mxu1 }
 0x12f   :  { %2099 = vmax.xlane.f32.xlu1 %v2098_v23  ;;  %v1350_v36 = vpop.f32.mrb[42].mxu0  ;;  %v1407_v56 = vpop.f32.mrb[42].mxu1 }
 0x130   :  { %v6453_v46 = vadd.f32 %v1350_v36, %v6244_v41  ;;  %v5247_v49 = vpop.f32.mrb[43].mxu0  ;;  %v2101_v50 = vsel %vm166_vm0, %v6447_v28, -inf  ;;  %v6458_v57 = vadd.f32 %v1407_v56, %v6244_v41  ;;  %v5253_v59 = vpop.f32.mrb[43].mxu1  ;;  %v2107_v7 = vsel %vm166_vm0, %v6450_v40, -inf }
 0x131   :  { %2102 = vmax.xlane.f32.xlu0 %v2101_v50 }
 0x132   :  { %v2104_v3 = vsel %vm166_vm0, %v6453_v46, -inf  ;;  %v2110_v9 = vsel %vm166_vm0, %v6458_v57, -inf }
 0x133   :  { %2105 = vmax.xlane.f32.xlu1 %v2104_v3 }
 0x135   :  { %2108 = vmax.xlane.f32.xlu0 %v2107_v7  ;;  %v1461_v12 = vpop.f32.mrb[44].mxu0  ;;  %v1518_v22 = vpop.f32.mrb[44].mxu1 }
 0x136   :  { %v6467_v16 = vadd.f32 %v1461_v12, %v6242_v39  ;;  %v5258_v18 = vpop.f32.mrb[45].mxu0  ;;  %v6470_v24 = vadd.f32 %v1518_v22, %v6242_v39  ;;  %v5264_v30 = vpop.f32.mrb[45].mxu1 }
 0x137   :  { %2111 = vmax.xlane.f32.xlu1 %v2110_v9  ;;  %v1464_v23 = vpop.f32.mrb[46].mxu0  ;;  %v1521_v49 = vpop.f32.mrb[46].mxu1 }
 0x138   :  { %v6473_v34 = vadd.f32 %v1464_v23, %v6244_v41  ;;  %v5259_v36 = vpop.f32.mrb[47].mxu0  ;;  %v2113_v44 = vsel %vm166_vm0, %v6467_v16, -inf  ;;  %v6478_v50 = vadd.f32 %v1521_v49, %v6244_v41  ;;  %v5265_v56 = vpop.f32.mrb[47].mxu1  ;;  %v2119_v3 = vsel %vm166_vm0, %v6470_v24, -inf }
 0x139   :  { %2114 = vmax.xlane.f32.xlu0 %v2113_v44 }
 0x13a   :  { %v2116_v59 = vsel %vm166_vm0, %v6473_v34, -inf  ;;  %v2122_v7 = vsel %vm166_vm0, %v6478_v50, -inf }
 0x13b   :  { %2117 = vmax.xlane.f32.xlu1 %v2116_v59 }
 0x13d   :  { %2120 = vmax.xlane.f32.xlu0 %v2119_v3  ;;  %v1575_v9 = vpop.f32.mrb[48].mxu0  ;;  %v1632_v22 = vpop.f32.mrb[48].mxu1 }
 0x13e   :  { %v6487_v12 = vadd.f32 %v1575_v9, %v6242_v39  ;;  %v5270_v18 = vpop.f32.mrb[49].mxu0  ;;  %v6490_v30 = vadd.f32 %v1632_v22, %v6242_v39  ;;  %v5276_v36 = vpop.f32.mrb[49].mxu1 }
 0x13f   :  { %2123 = vmax.xlane.f32.xlu1 %v2122_v7  ;;  %v1578_v23 = vpop.f32.mrb[50].mxu0  ;;  %v1635_v59 = vpop.f32.mrb[50].mxu1 }
 0x140   :  { %7460 = vst [vmem:[#allocation2_spill] sm:$0xff] %v6490_v30  ;;  %v6493_v44 = vadd.f32 %v1578_v23, %v6244_v41  ;;  %v5271_v49 = vpop.f32.mrb[51].mxu0  ;;  %v2125_v56 = vsel %vm166_vm0, %v6487_v12, -inf  ;;  %v6498_v3 = vadd.f32 %v1635_v59, %v6244_v41  ;;  %v5277_v9 = vpop.f32.mrb[51].mxu1  ;;  %v2131_v18 = vsel %vm166_vm0, %v6490_v30, -inf }
 0x141   :  { %2126 = vmax.xlane.f32.xlu0 %v2125_v56 }
 0x142   :  { %7461 = vst [vmem:[#allocation3_spill] sm:$0xff] %v6493_v44  ;;  %7462 = vst [vmem:[#allocation4_spill] sm:$0xff] %v6498_v3  ;;  %v2128_v7 = vsel %vm166_vm0, %v6493_v44, -inf  ;;  %v2134_v22 = vsel %vm166_vm0, %v6498_v3, -inf }
 0x143   :  { %2129 = vmax.xlane.f32.xlu1 %v2128_v7 }
 0x145   :  { %2132 = vmax.xlane.f32.xlu0 %v2131_v18  ;;  %v1689_v23 = vpop.f32.mrb[52].mxu0  ;;  %v1746_v56 = vpop.f32.mrb[52].mxu1 }
 0x146   :  { %v6507_v36 = vadd.f32 %v1689_v23, %v6242_v39  ;;  %v5282_v49 = vpop.f32.mrb[53].mxu0  ;;  %v6510_v9 = vadd.f32 %v1746_v56, %v6242_v39  ;;  %v5288_v0 = vpop.f32.mrb[53].mxu1 }
 0x147   :  { %2135 = vmax.xlane.f32.xlu1 %v2134_v22  ;;  %v1692_v59 = vpop.f32.mrb[54].mxu0  ;;  %v1749_v18 = vpop.f32.mrb[54].mxu1 }
 0x148   :  { %7463 = vst [vmem:[#allocation5_spill] sm:$0xff] %v6507_v36  ;;  %7464 = vst [vmem:[#allocation6_spill] sm:$0xff] %v6510_v9  ;;  %v6513_v44 = vadd.f32 %v1692_v59, %v6244_v41  ;;  %v5283_v7 = vpop.f32.mrb[55].mxu0  ;;  %v2137_v3 = vsel %vm166_vm0, %v6507_v36, -inf  ;;  %v6518_v23 = vadd.f32 %v1749_v18, %v6244_v41  ;;  %v5289_v49 = vpop.f32.mrb[55].mxu1  ;;  %v2143_v56 = vsel %vm166_vm0, %v6510_v9, -inf }
 0x149   :  { %2138 = vmax.xlane.f32.xlu0 %v2137_v3 }
 0x14a   :  { %7465 = vst [vmem:[#allocation7_spill] sm:$0xff] %v6513_v44  ;;  %7466 = vst [vmem:[#allocation8_spill] sm:$0xff] %v6518_v23  ;;  %v2140_v22 = vsel %vm166_vm0, %v6513_v44, -inf  ;;  %v2146_v0 = vsel %vm166_vm0, %v6518_v23, -inf }
 0x14b   :  { %2141 = vmax.xlane.f32.xlu1 %v2140_v22 }
 0x14d   :  { %2144 = vmax.xlane.f32.xlu0 %v2143_v56  ;;  %v1803_v59 = vpop.f32.mrb[56].mxu0  ;;  %v1860_v36 = vpop.f32.mrb[56].mxu1 }
 0x14e   :  { %v6527_v7 = vadd.f32 %v1803_v59, %v6242_v39  ;;  %v5294_v3 = vpop.f32.mrb[57].mxu0  ;;  %v6530_v49 = vadd.f32 %v1860_v36, %v6242_v39  ;;  %v5300_v44 = vpop.f32.mrb[57].mxu1 }
 0x14f   :  { %2147 = vmax.xlane.f32.xlu1 %v2146_v0  ;;  %v1806_v18 = vpop.f32.mrb[58].mxu0  ;;  %v1863_v56 = vpop.f32.mrb[58].mxu1 }
 0x150   :  { %7467 = vst [vmem:[#allocation9_spill] sm:$0xff] %v6527_v7  ;;  %7468 = vst [vmem:[#allocation10_spill] sm:$0xff] %v6530_v49  ;;  %v6533_v30 = vadd.f32 %v1806_v18, %v6244_v41  ;;  %v5295_v22 = vpop.f32.mrb[59].mxu0  ;;  %v2149_v23 = vsel %vm166_vm0, %v6527_v7, -inf  ;;  %v6538_v59 = vadd.f32 %v1863_v56, %v6244_v41  ;;  %v5301_v3 = vpop.f32.mrb[59].mxu1  ;;  %v2155_v36 = vsel %vm166_vm0, %v6530_v49, -inf }
 0x151   :  { %2150 = vmax.xlane.f32.xlu0 %v2149_v23 }
 0x152   :  { %7469 = vst [vmem:[#allocation11_spill] sm:$0xff] %v6533_v30  ;;  %7470 = vst [vmem:[#allocation12_spill] sm:$0xff] %v6538_v59  ;;  %v2152_v0 = vsel %vm166_vm0, %v6533_v30, -inf  ;;  %v2158_v44 = vsel %vm166_vm0, %v6538_v59, -inf }
 0x153   :  { %2153 = vmax.xlane.f32.xlu1 %v2152_v0 }
 0x155   :  { %2156 = vmax.xlane.f32.xlu0 %v2155_v36  ;;  %v1917_v18 = vpop.f32.mrb[60].mxu0  ;;  %v1974_v7 = vpop.f32.mrb[60].mxu1 }
 0x156   :  { %v6547_v22 = vadd.f32 %v1917_v18, %v6242_v39  ;;  %v5306_v23 = vpop.f32.mrb[61].mxu0  ;;  %v6550_v3 = vadd.f32 %v1974_v7, %v6242_v39  ;;  %v5312_v30 = vpop.f32.mrb[61].mxu1 }
 0x157   :  { %2159 = vmax.xlane.f32.xlu1 %v2158_v44  ;;  %v1920_v56 = vpop.f32.mrb[62].mxu0  ;;  %v1977_v36 = vpop.f32.mrb[62].mxu1 }
 0x158   :  { %7471 = vst [vmem:[#allocation13_spill] sm:$0xff] %v6547_v22  ;;  %7472 = vst [vmem:[#allocation14_spill] sm:$0xff] %v6550_v3  ;;  %v6553_v9 = vadd.f32 %v1920_v56, %v6244_v41  ;;  %v5307_v0 = vpop.f32.mrb[63].mxu0  ;;  %v2161_v59 = vsel %vm166_vm0, %v6547_v22, -inf  ;;  %v6558_v18 = vadd.f32 %v1977_v36, %v6244_v41  ;;  %v5313_v23 = vpop.f32.mrb[63].mxu1  ;;  %v2167_v39 = vsel %vm166_vm0, %v6550_v3, -inf }
 0x159   :  { %2162 = vmax.xlane.f32.xlu0 %v2161_v59 }
 0x15a   :  { %7473 = vst [vmem:[#allocation15_spill] sm:$0xff] %v6553_v9  ;;  %7474 = vst [vmem:[#allocation16_spill] sm:$0xff] %v6558_v18  ;;  %v2164_v44 = vsel %vm166_vm0, %v6553_v9, -inf  ;;  %v2170_v30 = vsel %vm166_vm0, %v6558_v18, -inf }
 0x15b   :  { %2165 = vmax.xlane.f32.xlu1 %v2164_v44 }
 0x15d   :  { %2168 = vmax.xlane.f32.xlu0 %v2167_v39 }
 0x15f   :  { %2171 = vmax.xlane.f32.xlu1 %v2170_v30 }
 0x16e   :  { %v1983_v7 = vpop.xlane.xlu0 %1982  ;;  %v1989_v56 = vpop.xlane.xlu1 %1988 }
 0x16f   :  { %v2173_v59 = vsub.f32 %v6247_v42, %v1983_v7  ;;  %v2175_v41 = vsub.f32 %v6250_v45, %v1989_v56 }
 0x171   :  { %v2237_v0 = vmul.f32 1.442695, %v2173_v59  ;;  %v2241_v36 = vmul.f32 1.442695, %v2175_v41 }
 0x172   :  { %v1986_v23 = vpop.xlane.xlu0 %1985  ;;  %v1992_v9 = vpop.xlane.xlu1 %1991 }
 0x173   :  { %5605 = vpow2.f32 %v2237_v0  ;;  %v2174_v22 = vsub.f32 %v6253_v48, %v1986_v23  ;;  %v2176_v44 = vsub.f32 %v6258_v52, %v1992_v9 }
 0x174   :  { %5607 = vpow2.f32 %v2241_v36 }
 0x175   :  { %v2239_v3 = vmul.f32 1.442695, %v2174_v22  ;;  %v2243_v18 = vmul.f32 1.442695, %v2176_v44 }
 0x176   :  { %v1995_v39 = vpop.xlane.xlu0 %1994 }
 0x177   :  { %5609 = vpow2.f32 %v2239_v3  ;;  %v2177_v30 = vsub.f32 %v6267_v58, %v1995_v39 }
 0x178   :  { %v1998_v49 = vpop.xlane.xlu1 %1997  ;;  %5611 = vpow2.f32 %v2243_v18 }
 0x179   :  { %v2245_v42 = vmul.f32 1.442695, %v2177_v30  ;;  %v2178_v45 = vsub.f32 %v6273_v1, %v1998_v49 }
 0x17a   :  { %v2001_v7 = vpop.xlane.xlu0 %2000 }
 0x17b   :  { %5613 = vpow2.f32 %v2245_v42  ;;  %v2247_v56 = vmul.f32 1.442695, %v2178_v45  ;;  %v2179_v59 = vsub.f32 %v6270_v62, %v2001_v7 }
 0x17c   :  { %v2004_v48 = vpop.xlane.xlu1 %2003 }
 0x17d   :  { %v6573_v41 = vpop.eup %5605  ;;  %5615 = vpow2.f32 %v2247_v56  ;;  %v2249_v52 = vmul.f32 1.442695, %v2179_v59  ;;  %v2180_v9 = vsub.f32 %v6278_v5, %v2004_v48 }
 0x17e   :  { %v2007_v22 = vpop.xlane.xlu0 %2006  ;;  %v2365_v58 = vsel %vm166_vm0, %v6573_v41, 0.0  ;;  %v6578_v3 = vpop.eup %5607 }
 0x17f   :  { %5617 = vpow2.f32 %v2249_v52  ;;  %v2251_v1 = vmul.f32 1.442695, %v2180_v9  ;;  %v2181_v49 = vsub.f32 %v6287_v11, %v2007_v22  ;;  %2366 = vadd.xlane.f32.xlu0 %v2365_v58  ;;  %v2371_v5 = vsel %vm166_vm0, %v6578_v3, 0.0 }
 0x180   :  { %v2010_v18 = vpop.xlane.xlu1 %2009 }
 0x181   :  { %v6581_v62 = vpop.eup %5609  ;;  %5619 = vpow2.f32 %v2251_v1  ;;  %v2253_v0 = vmul.f32 1.442695, %v2181_v49  ;;  %v2182_v36 = vsub.f32 %v6293_v17, %v2010_v18 }
 0x182   :  { %v2013_v23 = vpop.xlane.xlu0 %2012  ;;  %v2368_v44 = vsel %vm166_vm0, %v6581_v62, 0.0  ;;  %v6588_v39 = vpop.eup %5611 }
 0x183   :  { %5621 = vpow2.f32 %v2253_v0  ;;  %v2255_v30 = vmul.f32 1.442695, %v2182_v36  ;;  %v2183_v11 = vsub.f32 %v6290_v15, %v2013_v23  ;;  %2372 = vadd.xlane.f32.xlu0 %v2371_v5  ;;  %2369 = vadd.xlane.f32.xlu1 %v2368_v44  ;;  %v2374_v48 = vsel %vm166_vm0, %v6588_v39, 0.0 }
 0x184   :  { %v2016_v42 = vpop.xlane.xlu1 %2015 }
 0x185   :  { %v6591_v45 = vpop.eup %5613  ;;  %5623 = vpow2.f32 %v2255_v30  ;;  %v2257_v17 = vmul.f32 1.442695, %v2183_v11  ;;  %v2184_v7 = vsub.f32 %v6298_v21, %v2016_v42 }
 0x186   :  { %v2019_v56 = vpop.xlane.xlu0 %2018  ;;  %v2377_v59 = vsel %vm166_vm0, %v6591_v45, 0.0 }
 0x187   :  { %v6598_v52 = vpop.eup %5615  ;;  %5625 = vpow2.f32 %v2257_v17  ;;  %v2259_v15 = vmul.f32 1.442695, %v2184_v7  ;;  %v2185_v9 = vsub.f32 %v6307_v27, %v2019_v56  ;;  %2378 = vadd.xlane.f32.xlu0 %v2377_v59  ;;  %2375 = vadd.xlane.f32.xlu1 %v2374_v48 }
 0x188   :  { %v2022_v22 = vpop.xlane.xlu1 %2021  ;;  %v2380_v0 = vsel %vm166_vm0, %v6598_v52, 0.0 }
 0x189   :  { %v6601_v58 = vpop.eup %5617  ;;  %5627 = vpow2.f32 %v2259_v15  ;;  %v2261_v21 = vmul.f32 1.442695, %v2185_v9  ;;  %v2186_v1 = vsub.f32 %v6313_v33, %v2022_v22 }
 0x18a   :  { %v2025_v49 = vpop.xlane.xlu0 %2024  ;;  %v2383_v18 = vsel %vm166_vm0, %v6601_v58, 0.0 }
 0x18b   :  { %v6608_v36 = vpop.eup %5619  ;;  %5629 = vpow2.f32 %v2261_v21  ;;  %v2263_v27 = vmul.f32 1.442695, %v2186_v1  ;;  %v2187_v23 = vsub.f32 %v6310_v31, %v2025_v49  ;;  %2384 = vadd.xlane.f32.xlu0 %v2383_v18  ;;  %2381 = vadd.xlane.f32.xlu1 %v2380_v0 }
 0x18c   :  { %v2028_v5 = vpop.xlane.xlu1 %2027  ;;  %v2386_v17 = vsel %vm166_vm0, %v6608_v36, 0.0 }
 0x18d   :  { %v6611_v44 = vpop.eup %5621  ;;  %5631 = vpow2.f32 %v2263_v27  ;;  %v2265_v33 = vmul.f32 1.442695, %v2187_v23  ;;  %v2188_v30 = vsub.f32 %v6318_v37, %v2028_v5 }
 0x18e   :  { %v2031_v11 = vpop.xlane.xlu0 %2030  ;;  %v2389_v42 = vsel %vm166_vm0, %v6611_v44, 0.0 }
 0x18f   :  { %v6618_v7 = vpop.eup %5623  ;;  %5633 = vpow2.f32 %v2265_v33  ;;  %v2267_v31 = vmul.f32 1.442695, %v2188_v30  ;;  %v2189_v56 = vsub.f32 %v6327_v47, %v2031_v11  ;;  %2390 = vadd.xlane.f32.xlu0 %v2389_v42  ;;  %2387 = vadd.xlane.f32.xlu1 %v2386_v17 }
 0x190   :  { %v2034_v59 = vpop.xlane.xlu1 %2033  ;;  %v2392_v21 = vsel %vm166_vm0, %v6618_v7, 0.0 }
 0x191   :  { %v6621_v48 = vpop.eup %5625  ;;  %5635 = vpow2.f32 %v2267_v31  ;;  %v2269_v37 = vmul.f32 1.442695, %v2189_v56  ;;  %v2190_v15 = vsub.f32 %v6333_v55, %v2034_v59 }
 0x192   :  { %v2037_v9 = vpop.xlane.xlu0 %2036  ;;  %v2395_v22 = vsel %vm166_vm0, %v6621_v48, 0.0 }
 0x193   :  { %v6628_v1 = vpop.eup %5627  ;;  %5637 = vpow2.f32 %v2269_v37  ;;  %v2271_v47 = vmul.f32 1.442695, %v2190_v15  ;;  %v2191_v49 = vsub.f32 %v6330_v53, %v2037_v9  ;;  %2396 = vadd.xlane.f32.xlu0 %v2395_v22  ;;  %2393 = vadd.xlane.f32.xlu1 %v2392_v21 }
 0x194   :  { %v2040_v18 = vpop.xlane.xlu1 %2039  ;;  %v2398_v33 = vsel %vm166_vm0, %v6628_v1, 0.0 }
 0x195   :  { %v6631_v0 = vpop.eup %5629  ;;  %5639 = vpow2.f32 %v2271_v47  ;;  %v2273_v55 = vmul.f32 1.442695, %v2191_v49  ;;  %v2192_v27 = vsub.f32 %v6338_v60, %v2040_v18 }
 0x196   :  { %v2043_v23 = vpop.xlane.xlu0 %2042  ;;  %v2401_v5 = vsel %vm166_vm0, %v6631_v0, 0.0 }
 0x197   :  { %v6638_v30 = vpop.eup %5631  ;;  %5641 = vpow2.f32 %v2273_v55  ;;  %v2275_v53 = vmul.f32 1.442695, %v2192_v27  ;;  %v2193_v11 = vsub.f32 %v6347_v6, %v2043_v23  ;;  %2402 = vadd.xlane.f32.xlu0 %v2401_v5  ;;  %2399 = vadd.xlane.f32.xlu1 %v2398_v33 }
 0x198   :  { %v2046_v42 = vpop.xlane.xlu1 %2045  ;;  %v2404_v37 = vsel %vm166_vm0, %v6638_v30, 0.0 }
 0x199   :  { %v6641_v17 = vpop.eup %5633  ;;  %5643 = vpow2.f32 %v2275_v53  ;;  %v2277_v60 = vmul.f32 1.442695, %v2193_v11  ;;  %v2194_v31 = vsub.f32 %v6353_v13, %v2046_v42  ;;  %v5573_v13 = vld [vmem:[%s7426_s2] sm:$0xff]   ;;  %v7475_v53 = vmov 0.0  }
 0x19a   :  { %v2049_v56 = vpop.xlane.xlu0 %2048  ;;  %v2407_v59 = vsel %vm166_vm0, %v6641_v17, 0.0  ;;  %5315 = vmatpush3.bf16.msra.mxu0 %v5573_v13 }
 0x19b   :  { %v6648_v15 = vpop.eup %5635  ;;  %5645 = vpow2.f32 %v2277_v60  ;;  %v2279_v6 = vmul.f32 1.442695, %v2194_v31  ;;  %v2195_v9 = vsub.f32 %v6350_v10, %v2049_v56  ;;  %2408 = vadd.xlane.f32.xlu0 %v2407_v59  ;;  %2405 = vadd.xlane.f32.xlu1 %v2404_v37 }
 0x19c   :  { %v2052_v22 = vpop.xlane.xlu1 %2051  ;;  %v2410_v10 = vsel %vm166_vm0, %v6648_v15, 0.0  ;;  %5326 = vmatprep.subr.bf16.mxu0 %v7475_v53 }
 0x19d   :  { %v6654_v21 = vpop.eup %5637  ;;  %5647 = vpow2.f32 %v2279_v6  ;;  %v2281_v47 = vmul.f32 1.442695, %v2195_v9  ;;  %v2196_v49 = vsub.f32 %v6358_v19, %v2052_v22  ;;  %v5574_v19 = vld [vmem:[%s7426_s2 + $0x8] sm:$0xff]  }
 0x19e   :  { %v2055_v18 = vpop.xlane.xlu0 %2054  ;;  %v2413_v55 = vsel %vm166_vm0, %v6654_v21, 0.0  ;;  %5321 = vmatpush3.bf16.msra.mxu1 %v5574_v19 }
 0x19f   :  { %v6661_v27 = vpop.eup %5639  ;;  %5649 = vpow2.f32 %v2281_v47  ;;  %v2283_v23 = vmul.f32 1.442695, %v2196_v49  ;;  %v2197_v5 = vsub.f32 %v6367_v26, %v2055_v18  ;;  %2414 = vadd.xlane.f32.xlu0 %v2413_v55  ;;  %2411 = vadd.xlane.f32.xlu1 %v2410_v10 }
 0x1a0   :  { %v2058_v33 = vpop.xlane.xlu1 %2057  ;;  %v2416_v26 = vsel %vm166_vm0, %v6661_v27, 0.0  ;;  %5332 = vmatprep.subr.bf16.mxu1 %v7475_v53 }
 0x1a1   :  { %v6668_v11 = vpop.eup %5641  ;;  %5651 = vpow2.f32 %v2283_v23  ;;  %v2285_v42 = vmul.f32 1.442695, %v2197_v5  ;;  %v2198_v60 = vsub.f32 %v6373_v35, %v2058_v33 }
 0x1a2   :  { %v2061_v31 = vpop.xlane.xlu0 %2060  ;;  %v2419_v56 = vsel %vm166_vm0, %v6668_v11, 0.0 }
 0x1a3   :  { %v6675_v59 = vpop.eup %5643  ;;  %5653 = vpow2.f32 %v2285_v42  ;;  %v2287_v37 = vmul.f32 1.442695, %v2198_v60  ;;  %v2199_v6 = vsub.f32 %v6370_v32, %v2061_v31  ;;  %2420 = vadd.xlane.f32.xlu0 %v2419_v56  ;;  %2417 = vadd.xlane.f32.xlu1 %v2416_v26 }
 0x1a4   :  { %v2064_v9 = vpop.xlane.xlu1 %2063  ;;  %v2422_v18 = vsel %vm166_vm0, %v6675_v59, 0.0 }
 0x1a5   :  { %v6679_v35 = vpop.eup %5645  ;;  %5655 = vpow2.f32 %v2287_v37  ;;  %v2289_v22 = vmul.f32 1.442695, %v2199_v6  ;;  %v2200_v13 = vsub.f32 %v6378_v43, %v2064_v9 }
 0x1a6   :  { %v2067_v47 = vpop.xlane.xlu0 %2066  ;;  %v2425_v49 = vsel %vm166_vm0, %v6679_v35, 0.0 }
 0x1a7   :  { %v6686_v55 = vpop.eup %5647  ;;  %5657 = vpow2.f32 %v2289_v22  ;;  %v2291_v32 = vmul.f32 1.442695, %v2200_v13  ;;  %v2201_v10 = vsub.f32 %v6387_v54, %v2067_v47  ;;  %2426 = vadd.xlane.f32.xlu0 %v2425_v49  ;;  %2423 = vadd.xlane.f32.xlu1 %v2422_v18 }
 0x1a8   :  { %v2070_v23 = vpop.xlane.xlu1 %2069  ;;  %v2428_v60 = vsel %vm166_vm0, %v6686_v55, 0.0 }
 0x1a9   :  { %v6689_v5 = vpop.eup %5649  ;;  %5659 = vpow2.f32 %v2291_v32  ;;  %v2293_v43 = vmul.f32 1.442695, %v2201_v10  ;;  %v2202_v33 = vsub.f32 %v6393_v2, %v2070_v23 }
 0x1aa   :  { %v2073_v19 = vpop.xlane.xlu0 %2072  ;;  %v2431_v42 = vsel %vm166_vm0, %v6689_v5, 0.0 }
 0x1ab   :  { %v6696_v31 = vpop.eup %5651  ;;  %5661 = vpow2.f32 %v2293_v43  ;;  %v2295_v54 = vmul.f32 1.442695, %v2202_v33  ;;  %v2203_v56 = vsub.f32 %v6390_v61, %v2073_v19  ;;  %2432 = vadd.xlane.f32.xlu0 %v2431_v42  ;;  %2429 = vadd.xlane.f32.xlu1 %v2428_v60 }
 0x1ac   :  { %v2076_v26 = vpop.xlane.xlu1 %2075  ;;  %v2434_v13 = vsel %vm166_vm0, %v6696_v31, 0.0 }
 0x1ad   :  { %v6699_v37 = vpop.eup %5653  ;;  %5663 = vpow2.f32 %v2295_v54  ;;  %v2297_v2 = vmul.f32 1.442695, %v2203_v56  ;;  %v2204_v6 = vsub.f32 %v6398_v8, %v2076_v26 }
 0x1ae   :  { %v2079_v9 = vpop.xlane.xlu0 %2078  ;;  %v2437_v22 = vsel %vm166_vm0, %v6699_v37, 0.0 }
 0x1af   :  { %v6706_v47 = vpop.eup %5655  ;;  %5665 = vpow2.f32 %v2297_v2  ;;  %v2299_v61 = vmul.f32 1.442695, %v2204_v6  ;;  %v2205_v49 = vsub.f32 %v6407_v20, %v2079_v9  ;;  %2438 = vadd.xlane.f32.xlu0 %v2437_v22  ;;  %2435 = vadd.xlane.f32.xlu1 %v2434_v13 }
 0x1b0   :  { %v2082_v18 = vpop.xlane.xlu1 %2081  ;;  %v2440_v33 = vsel %vm166_vm0, %v6706_v47, 0.0 }
 0x1b1   :  { %v6709_v32 = vpop.eup %5657  ;;  %5667 = vpow2.f32 %v2299_v61  ;;  %v2301_v8 = vmul.f32 1.442695, %v2205_v49  ;;  %v2206_v10 = vsub.f32 %v6413_v29, %v2082_v18 }
 0x1b2   :  { %v2085_v23 = vpop.xlane.xlu0 %2084  ;;  %v2443_v43 = vsel %vm166_vm0, %v6709_v32, 0.0 }
 0x1b3   :  { %v6716_v19 = vpop.eup %5659  ;;  %5669 = vpow2.f32 %v2301_v8  ;;  %v2303_v20 = vmul.f32 1.442695, %v2206_v10  ;;  %v2207_v42 = vsub.f32 %v6410_v25, %v2085_v23  ;;  %2444 = vadd.xlane.f32.xlu0 %v2443_v43  ;;  %2441 = vadd.xlane.f32.xlu1 %v2440_v33 }
 0x1b4   :  { %v2088_v60 = vpop.xlane.xlu1 %2087  ;;  %v2446_v6 = vsel %vm166_vm0, %v6716_v19, 0.0 }
 0x1b5   :  { %v6719_v54 = vpop.eup %5661  ;;  %5671 = vpow2.f32 %v2303_v20  ;;  %v2305_v29 = vmul.f32 1.442695, %v2207_v42  ;;  %v2208_v56 = vsub.f32 %v6418_v38, %v2088_v60 }
 0x1b6   :  { %v2091_v26 = vpop.xlane.xlu0 %2090  ;;  %v2449_v2 = vsel %vm166_vm0, %v6719_v54, 0.0 }
 0x1b7   :  { %v6726_v9 = vpop.eup %5663  ;;  %5673 = vpow2.f32 %v2305_v29  ;;  %v2307_v25 = vmul.f32 1.442695, %v2208_v56  ;;  %v2209_v22 = vsub.f32 %v6427_v51, %v2091_v26  ;;  %2450 = vadd.xlane.f32.xlu0 %v2449_v2  ;;  %2447 = vadd.xlane.f32.xlu1 %v2446_v6 }
 0x1b8   :  { %v2094_v13 = vpop.xlane.xlu1 %2093  ;;  %v2452_v10 = vsel %vm166_vm0, %v6726_v9, 0.0 }
 0x1b9   :  { %v6729_v61 = vpop.eup %5665  ;;  %5675 = vpow2.f32 %v2307_v25  ;;  %v2309_v38 = vmul.f32 1.442695, %v2209_v22  ;;  %v2210_v49 = vsub.f32 %v6433_v4, %v2094_v13 }
 0x1ba   :  { %v2097_v18 = vpop.xlane.xlu0 %2096  ;;  %v2455_v8 = vsel %vm166_vm0, %v6729_v61, 0.0 }
 0x1bb   :  { %v6736_v23 = vpop.eup %5667  ;;  %5677 = vpow2.f32 %v2309_v38  ;;  %v2311_v51 = vmul.f32 1.442695, %v2210_v49  ;;  %v2211_v43 = vsub.f32 %v6430_v63, %v2097_v18  ;;  %2456 = vadd.xlane.f32.xlu0 %v2455_v8  ;;  %2453 = vadd.xlane.f32.xlu1 %v2452_v10 }
 0x1bc   :  { %v2100_v33 = vpop.xlane.xlu1 %2099  ;;  %v2458_v56 = vsel %vm166_vm0, %v6736_v23, 0.0 }
 0x1bd   :  { %v6739_v20 = vpop.eup %5669  ;;  %5679 = vpow2.f32 %v2311_v51  ;;  %v2313_v4 = vmul.f32 1.442695, %v2211_v43  ;;  %v2212_v42 = vsub.f32 %v6438_v14, %v2100_v33 }
 0x1be   :  { %v2103_v60 = vpop.xlane.xlu0 %2102  ;;  %v2461_v29 = vsel %vm166_vm0, %v6739_v20, 0.0 }
 0x1bf   :  { %v6746_v26 = vpop.eup %5671  ;;  %5681 = vpow2.f32 %v2313_v4  ;;  %v2315_v63 = vmul.f32 1.442695, %v2212_v42  ;;  %v2213_v2 = vsub.f32 %v6447_v28, %v2103_v60  ;;  %2462 = vadd.xlane.f32.xlu0 %v2461_v29  ;;  %2459 = vadd.xlane.f32.xlu1 %v2458_v56 }
 0x1c0   :  { %v2106_v6 = vpop.xlane.xlu1 %2105  ;;  %v2464_v49 = vsel %vm166_vm0, %v6746_v26, 0.0 }
 0x1c1   :  { %v6749_v25 = vpop.eup %5673  ;;  %5683 = vpow2.f32 %v2315_v63  ;;  %v2317_v14 = vmul.f32 1.442695, %v2213_v2  ;;  %v2214_v22 = vsub.f32 %v6453_v46, %v2106_v6 }
 0x1c2   :  { %v2109_v13 = vpop.xlane.xlu0 %2108  ;;  %v2467_v38 = vsel %vm166_vm0, %v6749_v25, 0.0 }
 0x1c3   :  { %v6756_v18 = vpop.eup %5675  ;;  %5685 = vpow2.f32 %v2317_v14  ;;  %v2319_v28 = vmul.f32 1.442695, %v2214_v22  ;;  %v2215_v8 = vsub.f32 %v6450_v40, %v2109_v13  ;;  %2468 = vadd.xlane.f32.xlu0 %v2467_v38  ;;  %2465 = vadd.xlane.f32.xlu1 %v2464_v49 }
 0x1c4   :  { %v2112_v10 = vpop.xlane.xlu1 %2111  ;;  %v2470_v42 = vsel %vm166_vm0, %v6756_v18, 0.0 }
 0x1c5   :  { %v6759_v51 = vpop.eup %5677  ;;  %5687 = vpow2.f32 %v2319_v28  ;;  %v2321_v46 = vmul.f32 1.442695, %v2215_v8  ;;  %v2216_v43 = vsub.f32 %v6458_v57, %v2112_v10 }
 0x1c6   :  { %v2115_v33 = vpop.xlane.xlu0 %2114  ;;  %v2473_v4 = vsel %vm166_vm0, %v6759_v51, 0.0 }
 0x1c7   :  { %v6766_v60 = vpop.eup %5679  ;;  %5689 = vpow2.f32 %v2321_v46  ;;  %v2323_v40 = vmul.f32 1.442695, %v2216_v43  ;;  %v2217_v29 = vsub.f32 %v6467_v16, %v2115_v33  ;;  %2474 = vadd.xlane.f32.xlu0 %v2473_v4  ;;  %2471 = vadd.xlane.f32.xlu1 %v2470_v42 }
 0x1c8   :  { %v2118_v56 = vpop.xlane.xlu1 %2117  ;;  %v2476_v22 = vsel %vm166_vm0, %v6766_v60, 0.0 }
 0x1c9   :  { %v6769_v63 = vpop.eup %5681  ;;  %5691 = vpow2.f32 %v2323_v40  ;;  %v2325_v57 = vmul.f32 1.442695, %v2217_v29  ;;  %v2218_v2 = vsub.f32 %v6473_v34, %v2118_v56  ;;  %v7476_v29 = vld [vmem:[#allocation3_spill] sm:$0xff] }
 0x1ca   :  { %v2121_v6 = vpop.xlane.xlu0 %2120  ;;  %v2479_v14 = vsel %vm166_vm0, %v6769_v63, 0.0 }
 0x1cb   :  { %v6776_v13 = vpop.eup %5683  ;;  %5693 = vpow2.f32 %v2325_v57  ;;  %v2327_v16 = vmul.f32 1.442695, %v2218_v2  ;;  %v2219_v38 = vsub.f32 %v6470_v24, %v2121_v6  ;;  %2480 = vadd.xlane.f32.xlu0 %v2479_v14  ;;  %2477 = vadd.xlane.f32.xlu1 %v2476_v22  ;;  %v7477_v22 = vld [vmem:[#allocation2_spill] sm:$0xff] }
 0x1cc   :  { %v2124_v49 = vpop.xlane.xlu1 %2123  ;;  %v2482_v43 = vsel %vm166_vm0, %v6776_v13, 0.0 }
 0x1cd   :  { %v6779_v28 = vpop.eup %5685  ;;  %5695 = vpow2.f32 %v2327_v16  ;;  %v2329_v34 = vmul.f32 1.442695, %v2219_v38  ;;  %v2220_v8 = vsub.f32 %v6478_v50, %v2124_v49 }
 0x1ce   :  { %v2127_v10 = vpop.xlane.xlu0 %2126  ;;  %v2485_v46 = vsel %vm166_vm0, %v6779_v28, 0.0 }
 0x1cf   :  { %v6786_v33 = vpop.eup %5687  ;;  %5697 = vpow2.f32 %v2329_v34  ;;  %v2331_v24 = vmul.f32 1.442695, %v2220_v8  ;;  %v2221_v4 = vsub.f32 %v6487_v12, %v2127_v10  ;;  %2486 = vadd.xlane.f32.xlu0 %v2485_v46  ;;  %2483 = vadd.xlane.f32.xlu1 %v2482_v43  ;;  %v7478_v8 = vld [vmem:[#allocation4_spill] sm:$0xff] }
 0x1d0   :  { %v2130_v42 = vpop.xlane.xlu1 %2129  ;;  %v2488_v6 = vsel %vm166_vm0, %v6786_v33, 0.0 }
 0x1d1   :  { %v6789_v40 = vpop.eup %5689  ;;  %5699 = vpow2.f32 %v2331_v24  ;;  %v2333_v50 = vmul.f32 1.442695, %v2221_v4  ;;  %v2222_v56 = vsub.f32 %v7476_v29, %v2130_v42 }
 0x1d2   :  { %v2133_v57 = vpop.xlane.xlu0 %2132  ;;  %v2491_v2 = vsel %vm166_vm0, %v6789_v40, 0.0 }
 0x1d3   :  { %v6796_v14 = vpop.eup %5691  ;;  %5701 = vpow2.f32 %v2333_v50  ;;  %v2335_v12 = vmul.f32 1.442695, %v2222_v56  ;;  %v2223_v16 = vsub.f32 %v7477_v22, %v2133_v57  ;;  %2492 = vadd.xlane.f32.xlu0 %v2491_v2  ;;  %2489 = vadd.xlane.f32.xlu1 %v2488_v6  ;;  %v7479_v50 = vld [vmem:[#allocation5_spill] sm:$0xff]  ;;  %v7481_v6 = vld [vmem:[#allocation7_spill] sm:$0xff] }
 0x1d4   :  { %v2136_v38 = vpop.xlane.xlu1 %2135  ;;  %v2494_v24 = vsel %vm166_vm0, %v6796_v14, 0.0 }
 0x1d5   :  { %v6799_v49 = vpop.eup %5693  ;;  %5703 = vpow2.f32 %v2335_v12  ;;  %v2337_v34 = vmul.f32 1.442695, %v2223_v16  ;;  %v2224_v10 = vsub.f32 %v7478_v8, %v2136_v38 }
 0x1d6   :  { %v2139_v46 = vpop.xlane.xlu0 %2138  ;;  %v2497_v43 = vsel %vm166_vm0, %v6799_v49, 0.0 }
 0x1d7   :  { %v6806_v4 = vpop.eup %5695  ;;  %5705 = vpow2.f32 %v2337_v34  ;;  %v2339_v42 = vmul.f32 1.442695, %v2224_v10  ;;  %v2225_v29 = vsub.f32 %v7479_v50, %v2139_v46  ;;  %2498 = vadd.xlane.f32.xlu0 %v2497_v43  ;;  %2495 = vadd.xlane.f32.xlu1 %v2494_v24  ;;  %v7483_v10 = vld [vmem:[#allocation6_spill] sm:$0xff]  ;;  %v7485_v50 = vld [vmem:[#allocation8_spill] sm:$0xff] }
 0x1d8   :  { %v2142_v56 = vpop.xlane.xlu1 %2141  ;;  %v2500_v38 = vsel %vm166_vm0, %v6806_v4, 0.0 }
 0x1d9   :  { %v6809_v57 = vpop.eup %5697  ;;  %5707 = vpow2.f32 %v2339_v42  ;;  %v2341_v2 = vmul.f32 1.442695, %v2225_v29  ;;  %v2226_v12 = vsub.f32 %v7481_v6, %v2142_v56 }
 0x1da   :  { %7480 = vst [vmem:[#allocation3_spill] sm:$0xff] %v6809_v57  ;;  %v2145_v22 = vpop.xlane.xlu0 %2144  ;;  %v2503_v16 = vsel %vm166_vm0, %v6809_v57, 0.0 }
 0x1db   :  { %v6816_v34 = vpop.eup %5699  ;;  %5709 = vpow2.f32 %v2341_v2  ;;  %v2343_v8 = vmul.f32 1.442695, %v2226_v12  ;;  %v2227_v46 = vsub.f32 %v7483_v10, %v2145_v22  ;;  %2504 = vadd.xlane.f32.xlu0 %v2503_v16  ;;  %2501 = vadd.xlane.f32.xlu1 %v2500_v38  ;;  %v7487_v22 = vld [vmem:[#allocation9_spill] sm:$0xff] }
 0x1dc   :  { %7482 = vst [vmem:[#allocation2_spill] sm:$0xff] %v6816_v34  ;;  %v2148_v43 = vpop.xlane.xlu1 %2147  ;;  %v2506_v57 = vsel %vm166_vm0, %v6816_v34, 0.0 }
 0x1dd   :  { %v6819_v24 = vpop.eup %5701  ;;  %5711 = vpow2.f32 %v2343_v8  ;;  %v2345_v42 = vmul.f32 1.442695, %v2227_v46  ;;  %v2228_v29 = vsub.f32 %v7485_v50, %v2148_v43  ;;  %v7489_v46 = vld [vmem:[#allocation11_spill] sm:$0xff] }
 0x1de   :  { %7484 = vst [vmem:[#allocation4_spill] sm:$0xff] %v6819_v24  ;;  %v2151_v56 = vpop.xlane.xlu0 %2150  ;;  %v2509_v6 = vsel %vm166_vm0, %v6819_v24, 0.0 }
 0x1df   :  { %v6826_v2 = vpop.eup %5703  ;;  %5713 = vpow2.f32 %v2345_v42  ;;  %v2347_v12 = vmul.f32 1.442695, %v2228_v29  ;;  %v2229_v16 = vsub.f32 %v7487_v22, %v2151_v56  ;;  %2510 = vadd.xlane.f32.xlu0 %v2509_v6  ;;  %2507 = vadd.xlane.f32.xlu1 %v2506_v57  ;;  %v7491_v56 = vld [vmem:[#allocation10_spill] sm:$0xff] }
 0x1e0   :  { %7486 = vst [vmem:[#allocation5_spill] sm:$0xff] %v6826_v2  ;;  %v2154_v38 = vpop.xlane.xlu1 %2153  ;;  %v2512_v34 = vsel %vm166_vm0, %v6826_v2, 0.0 }
 0x1e1   :  { %v6829_v8 = vpop.eup %5705  ;;  %5715 = vpow2.f32 %v2347_v12  ;;  %v2349_v10 = vmul.f32 1.442695, %v2229_v16  ;;  %v2230_v43 = vsub.f32 %v7489_v46, %v2154_v38  ;;  %v7493_v16 = vld [vmem:[#allocation12_spill] sm:$0xff] }
 0x1e2   :  { %7488 = vst [vmem:[#allocation7_spill] sm:$0xff] %v6829_v8  ;;  %v2157_v50 = vpop.xlane.xlu0 %2156  ;;  %v2515_v24 = vsel %vm166_vm0, %v6829_v8, 0.0 }
 0x1e3   :  { %v6836_v42 = vpop.eup %5707  ;;  %5717 = vpow2.f32 %v2349_v10  ;;  %v2351_v29 = vmul.f32 1.442695, %v2230_v43  ;;  %v2231_v57 = vsub.f32 %v7491_v56, %v2157_v50  ;;  %2516 = vadd.xlane.f32.xlu0 %v2515_v24  ;;  %2513 = vadd.xlane.f32.xlu1 %v2512_v34  ;;  %v7495_v24 = vld [vmem:[#allocation13_spill] sm:$0xff] }
 0x1e4   :  { %7490 = vst [vmem:[#allocation6_spill] sm:$0xff] %v6836_v42  ;;  %v2160_v6 = vpop.xlane.xlu1 %2159  ;;  %v2518_v2 = vsel %vm166_vm0, %v6836_v42, 0.0 }
 0x1e5   :  { %v6839_v12 = vpop.eup %5709  ;;  %5719 = vpow2.f32 %v2351_v29  ;;  %v2353_v22 = vmul.f32 1.442695, %v2231_v57  ;;  %v2232_v38 = vsub.f32 %v7493_v16, %v2160_v6  ;;  %v7497_v57 = vld [vmem:[#allocation15_spill] sm:$0xff] }
 0x1e6   :  { %7492 = vst [vmem:[#allocation8_spill] sm:$0xff] %v6839_v12  ;;  %v2163_v46 = vpop.xlane.xlu0 %2162  ;;  %v2521_v8 = vsel %vm166_vm0, %v6839_v12, 0.0 }
 0x1e7   :  { %v6846_v10 = vpop.eup %5711  ;;  %5721 = vpow2.f32 %v2353_v22  ;;  %v2355_v43 = vmul.f32 1.442695, %v2232_v38  ;;  %v2233_v34 = vsub.f32 %v7495_v24, %v2163_v46  ;;  %2522 = vadd.xlane.f32.xlu0 %v2521_v8  ;;  %2519 = vadd.xlane.f32.xlu1 %v2518_v2  ;;  %v7498_v8 = vld [vmem:[#allocation14_spill] sm:$0xff] }
 0x1e8   :  { %7494 = vst [vmem:[#allocation9_spill] sm:$0xff] %v6846_v10  ;;  %v2166_v50 = vpop.xlane.xlu1 %2165  ;;  %v2524_v42 = vsel %vm166_vm0, %v6846_v10, 0.0 }
 0x1e9   :  { %v6849_v29 = vpop.eup %5713  ;;  %5723 = vpow2.f32 %v2355_v43  ;;  %v2357_v56 = vmul.f32 1.442695, %v2233_v34  ;;  %v2234_v6 = vsub.f32 %v7497_v57, %v2166_v50  ;;  %v7499_v34 = vld [vmem:[#allocation16_spill] sm:$0xff] }
 0x1ea   :  { %7496 = vst [vmem:[#allocation11_spill] sm:$0xff] %v6849_v29  ;;  %v2169_v16 = vpop.xlane.xlu0 %2168  ;;  %v2527_v12 = vsel %vm166_vm0, %v6849_v29, 0.0 }
 0x1eb   :  { %v6856_v22 = vpop.eup %5715  ;;  %5725 = vpow2.f32 %v2357_v56  ;;  %v2359_v38 = vmul.f32 1.442695, %v2234_v6  ;;  %v2235_v2 = vsub.f32 %v7498_v8, %v2169_v16  ;;  %2528 = vadd.xlane.f32.xlu0 %v2527_v12  ;;  %2525 = vadd.xlane.f32.xlu1 %v2524_v42 }
 0x1ec   :  { %v2172_v46 = vpop.xlane.xlu1 %2171  ;;  %v2530_v29 = vsel %vm166_vm0, %v6856_v22, 0.0 }
 0x1ed   :  { %v6859_v43 = vpop.eup %5717  ;;  %5727 = vpow2.f32 %v2359_v38  ;;  %v2361_v24 = vmul.f32 1.442695, %v2235_v2  ;;  %v2236_v50 = vsub.f32 %v7499_v34, %v2172_v46 }
 0x1ee   :  { %v2533_v57 = vsel %vm166_vm0, %v6859_v43, 0.0 }
 0x1ef   :  { %v6866_v10 = vpop.eup %5719  ;;  %5729 = vpow2.f32 %v2361_v24  ;;  %v2363_v56 = vmul.f32 1.442695, %v2236_v50  ;;  %2534 = vadd.xlane.f32.xlu0 %v2533_v57  ;;  %2531 = vadd.xlane.f32.xlu1 %v2530_v29 }
 0x1f0   :  { %v2536_v6 = vsel %vm166_vm0, %v6866_v10, 0.0 }
 0x1f1   :  { %v6868_v42 = vpop.eup %5721  ;;  %5731 = vpow2.f32 %v2363_v56 }
 0x1f2   :  { %7500 = vst [vmem:[#allocation10_spill] sm:$0xff] %v6868_v42  ;;  %v2539_v12 = vsel %vm166_vm0, %v6868_v42, 0.0 }
 0x1f3   :  { %v6874_v16 = vpop.eup %5723  ;;  %2540 = vadd.xlane.f32.xlu0 %v2539_v12  ;;  %2537 = vadd.xlane.f32.xlu1 %v2536_v6 }
 0x1f4   :  { %7501 = vst [vmem:[#allocation12_spill] sm:$0xff] %v6874_v16  ;;  %v2542_v29 = vsel %vm166_vm0, %v6874_v16, 0.0 }
 0x1f5   :  { %v6876_v38 = vpop.eup %5725 }
 0x1f6   :  { %7502 = vst [vmem:[#allocation13_spill] sm:$0xff] %v6876_v38  ;;  %v2545_v8 = vsel %vm166_vm0, %v6876_v38, 0.0 }
 0x1f7   :  { %v6882_v2 = vpop.eup %5727  ;;  %2546 = vadd.xlane.f32.xlu0 %v2545_v8  ;;  %2543 = vadd.xlane.f32.xlu1 %v2542_v29 }
 0x1f8   :  { %7503 = vst [vmem:[#allocation15_spill] sm:$0xff] %v6882_v2  ;;  %v2548_v34 = vsel %vm166_vm0, %v6882_v2, 0.0 }
 0x1f9   :  { %v6884_v46 = vpop.eup %5729 }
 0x1fa   :  { %7504 = vst [vmem:[#allocation14_spill] sm:$0xff] %v6884_v46  ;;  %v2551_v24 = vsel %vm166_vm0, %v6884_v46, 0.0 }
 0x1fb   :  { %v6890_v50 = vpop.eup %5731  ;;  %2552 = vadd.xlane.f32.xlu0 %v2551_v24  ;;  %2549 = vadd.xlane.f32.xlu1 %v2548_v34 }
 0x1fc   :  { %7505 = vst [vmem:[#allocation16_spill] sm:$0xff] %v6890_v50  ;;  %v2554_v57 = vsel %vm166_vm0, %v6890_v50, 0.0 }
 0x1ff   :  { %2555 = vadd.xlane.f32.xlu1 %v2554_v57 }
 0x20c   :  { %v2367_v56 = vpop.xlane.xlu0 %2366 }
 0x20d   :  { %5733 = vrcp.f32 %v2367_v56 }
 0x210   :  { %v2373_v12 = vpop.xlane.xlu0 %2372  ;;  %v2370_v6 = vpop.xlane.xlu1 %2369 }
 0x211   :  { %5735 = vrcp.f32 %v2370_v6 }
 0x212   :  { %5737 = vrcp.f32 %v2373_v12  ;;  %v5575_v12 = vld [vmem:[%s7426_s2 + $0x10] sm:$0xff]  }
 0x214   :  { %v2379_v8 = vpop.xlane.xlu0 %2378  ;;  %v2376_v29 = vpop.xlane.xlu1 %2375 }
 0x215   :  { %5739 = vrcp.f32 %v2376_v29 }
 0x216   :  { %5741 = vrcp.f32 %v2379_v8 }
 0x217   :  { %v5734_v38 = vpop.eup %5733 }
 0x218   :  { %v2385_v46 = vpop.xlane.xlu0 %2384  ;;  %v2382_v2 = vpop.xlane.xlu1 %2381  ;;  %v2621_v57 = vmul.f32 %v5734_v38, %v6573_v41 }
 0x219   :  { %5743 = vrcp.f32 %v2382_v2 }
 0x21a   :  { %5745 = vrcp.f32 %v2385_v46 }
 0x21b   :  { %v5736_v24 = vpop.eup %5735 }
 0x21c   :  { %v2391_v34 = vpop.xlane.xlu0 %2390  ;;  %v2388_v16 = vpop.xlane.xlu1 %2387  ;;  %v2622_v56 = vmul.f32 %v5736_v24, %v6581_v62  ;;  %v5576_v62 = vld [vmem:[%s7426_s2 + $0x18] sm:$0xff]  }
 0x21d   :  { %v5738_v50 = vpop.eup %5737  ;;  %5747 = vrcp.f32 %v2388_v16 }
 0x21e   :  { %v2685_v6 = vpack.c.bf16 %v2622_v56, %v2621_v57  ;;  %5749 = vrcp.f32 %v2391_v34  ;;  %v2623_v2 = vmul.f32 %v5738_v50, %v6578_v3  ;;  %v5577_v34 = vld [vmem:[%s7426_s2 + $0x20] sm:$0xff]  }
 0x21f   :  { %v5740_v8 = vpop.eup %5739 }
 0x220   :  { %v2397_v29 = vpop.xlane.xlu0 %2396  ;;  %v2394_v42 = vpop.xlane.xlu1 %2393  ;;  %v2624_v46 = vmul.f32 %v5740_v8, %v6588_v39  ;;  %5317 = vmatmul.mubr.msk.bf16.vlgmr.msra.gmra.mrb[64].mxu0 %vm166_vm0, %v2685_v6 }
 0x221   :  { %v5742_v41 = vpop.eup %5741  ;;  %5751 = vrcp.f32 %v2394_v42  ;;  %5327 = vmatpush3.bf16.msra.mxu0 %v5575_v12  ;;  %5328 = vmatprep.mubr.msk.bf16.mxu0 %vm5862_vm1, %v7475_v53 }
 0x222   :  { %v2686_v16 = vpack.c.bf16 %v2624_v46, %v2623_v2  ;;  %5338 = vmatprep.subr.bf16.mxu0 %v7475_v53  ;;  %5753 = vrcp.f32 %v2397_v29  ;;  %v2625_v39 = vmul.f32 %v5742_v41, %v6591_v45  ;;  %v5578_v29 = vld [vmem:[%s7426_s2 + $0x28] sm:$0xff]  }
 0x223   :  { %v5744_v38 = vpop.eup %5743 }
 0x224   :  { %v2403_v3 = vpop.xlane.xlu0 %2402  ;;  %v2400_v50 = vpop.xlane.xlu1 %2399  ;;  %v2626_v24 = vmul.f32 %v5744_v38, %v6598_v52  ;;  %5323 = vmatmul.mubr.msk.bf16.vlgmr.msra.gmra.mrb[64].mxu1 %vm166_vm0, %v2686_v16  ;;  %v5579_v38 = vld [vmem:[%s7426_s2 + $0x30] sm:$0xff]  }
 0x225   :  { %v5746_v42 = vpop.eup %5745  ;;  %5333 = vmatpush3.bf16.msra.mxu1 %v5576_v62  ;;  %5755 = vrcp.f32 %v2400_v50  ;;  %5334 = vmatprep.mubr.msk.bf16.mxu1 %vm5862_vm1, %v7475_v53 }
 0x226   :  { %v2687_v57 = vpack.c.bf16 %v2626_v24, %v2625_v39  ;;  %5344 = vmatprep.subr.bf16.mxu1 %v7475_v53  ;;  %5757 = vrcp.f32 %v2403_v3  ;;  %v2627_v52 = vmul.f32 %v5746_v42, %v6601_v58 }
 0x227   :  { %v5748_v56 = vpop.eup %5747 }
 0x228   :  { %v2409_v45 = vpop.xlane.xlu0 %2408  ;;  %v2406_v12 = vpop.xlane.xlu1 %2405  ;;  %v2628_v6 = vmul.f32 %v5748_v56, %v6608_v36  ;;  %5329 = vmatmul.mubr.msk.bf16.vlgmr.msra.gmra.mrb[68].mxu0 %vm166_vm0, %v2687_v57 }
 0x229   :  { %v5750_v8 = vpop.eup %5749  ;;  %5759 = vrcp.f32 %v2406_v12  ;;  %5339 = vmatpush3.bf16.msra.mxu0 %v5577_v34  ;;  %5340 = vmatprep.mubr.msk.bf16.mxu0 %vm5862_vm1, %v7475_v53  ;;  %v5580_v34 = vld [vmem:[%s7426_s2 + $0x38] sm:$0xff]  }
 0x22a   :  { %v2688_v2 = vpack.c.bf16 %v2628_v6, %v2627_v52  ;;  %5350 = vmatprep.subr.bf16.mxu0 %v7475_v53  ;;  %5761 = vrcp.f32 %v2409_v45  ;;  %v2629_v36 = vmul.f32 %v5750_v8, %v6611_v44  ;;  %v5581_v6 = vld [vmem:[%s7426_s2 + $0x40] sm:$0xff]  }
 0x22b   :  { %v5752_v46 = vpop.eup %5751 }
 0x22c   :  { %v2415_v58 = vpop.xlane.xlu0 %2414  ;;  %v2412_v41 = vpop.xlane.xlu1 %2411  ;;  %v2630_v62 = vmul.f32 %v5752_v46, %v6618_v7  ;;  %5335 = vmatmul.mubr.msk.bf16.vlgmr.msra.gmra.mrb[68].mxu1 %vm166_vm0, %v2688_v2 }
 0x22d   :  { %v5754_v16 = vpop.eup %5753  ;;  %5345 = vmatpush3.bf16.msra.mxu1 %v5578_v29  ;;  %5763 = vrcp.f32 %v2412_v41  ;;  %5346 = vmatprep.mubr.msk.bf16.mxu1 %vm5862_vm1, %v7475_v53  ;;  %v5582_v41 = vld [vmem:[%s7426_s2 + $0x48] sm:$0xff]  }
 0x22e   :  { %v2689_v3 = vpack.c.bf16 %v2630_v62, %v2629_v36  ;;  %5356 = vmatprep.subr.bf16.mxu1 %v7475_v53  ;;  %5765 = vrcp.f32 %v2415_v58  ;;  %v2631_v7 = vmul.f32 %v5754_v16, %v6621_v48 }
 0x22f   :  { %v5756_v50 = vpop.eup %5755 }
 0x230   :  { %v2421_v44 = vpop.xlane.xlu0 %2420  ;;  %v2418_v39 = vpop.xlane.xlu1 %2417  ;;  %v2632_v24 = vmul.f32 %v5756_v50, %v6628_v1  ;;  %5341 = vmatmul.mubr.msk.bf16.vlgmr.msra.gmra.mrb[72].mxu0 %vm166_vm0, %v2689_v3  ;;  %v5583_v50 = vld [vmem:[%s7426_s2 + $0x50] sm:$0xff]  }
 0x231   :  { %v5758_v42 = vpop.eup %5757  ;;  %5767 = vrcp.f32 %v2418_v39  ;;  %5351 = vmatpush3.bf16.msra.mxu0 %v5579_v38  ;;  %5352 = vmatprep.mubr.msk.bf16.mxu0 %vm5862_vm1, %v7475_v53 }
 0x232   :  { %v2690_v57 = vpack.c.bf16 %v2632_v24, %v2631_v7  ;;  %5362 = vmatprep.subr.bf16.mxu0 %v7475_v53  ;;  %5769 = vrcp.f32 %v2421_v44  ;;  %v2633_v1 = vmul.f32 %v5758_v42, %v6631_v0 }
 0x233   :  { %v5760_v56 = vpop.eup %5759 }
 0x234   :  { %v2427_v48 = vpop.xlane.xlu0 %2426  ;;  %v2424_v45 = vpop.xlane.xlu1 %2423  ;;  %v2634_v12 = vmul.f32 %v5760_v56, %v6638_v30  ;;  %5347 = vmatmul.mubr.msk.bf16.vlgmr.msra.gmra.mrb[72].mxu1 %vm166_vm0, %v2690_v57 }
 0x235   :  { %v5762_v52 = vpop.eup %5761  ;;  %5357 = vmatpush3.bf16.msra.mxu1 %v5580_v34  ;;  %5771 = vrcp.f32 %v2424_v45  ;;  %5358 = vmatprep.mubr.msk.bf16.mxu1 %vm5862_vm1, %v7475_v53  ;;  %v5584_v34 = vld [vmem:[%s7426_s2 + $0x58] sm:$0xff]  }
 0x236   :  { %v2691_v8 = vpack.c.bf16 %v2634_v12, %v2633_v1  ;;  %5368 = vmatprep.subr.bf16.mxu1 %v7475_v53  ;;  %5773 = vrcp.f32 %v2427_v48  ;;  %v2635_v30 = vmul.f32 %v5762_v52, %v6641_v17  ;;  %v5585_v12 = vld [vmem:[%s7426_s2 + $0x60] sm:$0xff]  }
 0x237   :  { %v5764_v29 = vpop.eup %5763 }
 0x238   :  { %v2433_v0 = vpop.xlane.xlu0 %2432  ;;  %v2430_v2 = vpop.xlane.xlu1 %2429  ;;  %v2636_v46 = vmul.f32 %v5764_v29, %v6648_v15  ;;  %5353 = vmatmul.mubr.msk.bf16.vlgmr.msra.gmra.mrb[76].mxu0 %vm166_vm0, %v2691_v8 }
 0x239   :  { %v5766_v58 = vpop.eup %5765  ;;  %5775 = vrcp.f32 %v2430_v2  ;;  %5363 = vmatpush3.bf16.msra.mxu0 %v5581_v6  ;;  %5364 = vmatprep.mubr.msk.bf16.mxu0 %vm5862_vm1, %v7475_v53  ;;  %v5586_v2 = vld [vmem:[%s7426_s2 + $0x68] sm:$0xff]  }
 0x23a   :  { %v2692_v36 = vpack.c.bf16 %v2636_v46, %v2635_v30  ;;  %5374 = vmatprep.subr.bf16.mxu0 %v7475_v53  ;;  %5777 = vrcp.f32 %v2433_v0  ;;  %v2637_v15 = vmul.f32 %v5766_v58, %v6654_v21 }
 0x23b   :  { %v5768_v62 = vpop.eup %5767 }
 0x23c   :  { %v2439_v17 = vpop.xlane.xlu0 %2438  ;;  %v2436_v16 = vpop.xlane.xlu1 %2435  ;;  %v2638_v38 = vmul.f32 %v5768_v62, %v6661_v27  ;;  %5359 = vmatmul.mubr.msk.bf16.vlgmr.msra.gmra.mrb[76].mxu1 %vm166_vm0, %v2692_v36  ;;  %v5587_v62 = vld [vmem:[%s7426_s2 + $0x70] sm:$0xff]  }
 0x23d   :  { %v5770_v3 = vpop.eup %5769  ;;  %5369 = vmatpush3.bf16.msra.mxu1 %v5582_v41  ;;  %5779 = vrcp.f32 %v2436_v16  ;;  %5370 = vmatprep.mubr.msk.bf16.mxu1 %vm5862_vm1, %v7475_v53 }
 0x23e   :  { %v2693_v44 = vpack.c.bf16 %v2638_v38, %v2637_v15  ;;  %5380 = vmatprep.subr.bf16.mxu1 %v7475_v53  ;;  %5781 = vrcp.f32 %v2439_v17  ;;  %v2639_v27 = vmul.f32 %v5770_v3, %v6668_v11 }
 0x23f   :  { %v5772_v39 = vpop.eup %5771 }
 0x240   :  { %v2445_v21 = vpop.xlane.xlu0 %2444  ;;  %v2442_v7 = vpop.xlane.xlu1 %2441  ;;  %v2640_v24 = vmul.f32 %v5772_v39, %v6675_v59  ;;  %5365 = vmatmul.mubr.msk.bf16.vlgmr.msra.gmra.mrb[80].mxu0 %vm166_vm0, %v2693_v44 }
 0x241   :  { %v5774_v42 = vpop.eup %5773  ;;  %5783 = vrcp.f32 %v2442_v7  ;;  %5375 = vmatpush3.bf16.msra.mxu0 %v5583_v50  ;;  %5376 = vmatprep.mubr.msk.bf16.mxu0 %vm5862_vm1, %v7475_v53  ;;  %v5588_v50 = vld [vmem:[%s7426_s2 + $0x78] sm:$0xff]  }
 0x242   :  { %v2694_v57 = vpack.c.bf16 %v2640_v24, %v2639_v27  ;;  %5386 = vmatprep.subr.bf16.mxu0 %v7475_v53  ;;  %5785 = vrcp.f32 %v2445_v21  ;;  %v2641_v59 = vmul.f32 %v5774_v42, %v6679_v35  ;;  %v5589_v24 = vld [vmem:[%s7426_s2 + $0x80] sm:$0xff]  }
 0x243   :  { %v5776_v56 = vpop.eup %5775 }
 0x244   :  { %v2451_v11 = vpop.xlane.xlu0 %2450  ;;  %v2448_v48 = vpop.xlane.xlu1 %2447  ;;  %v2642_v45 = vmul.f32 %v5776_v56, %v6686_v55  ;;  %5371 = vmatmul.mubr.msk.bf16.vlgmr.msra.gmra.mrb[80].mxu1 %vm166_vm0, %v2694_v57 }
 0x245   :  { %v5778_v1 = vpop.eup %5777  ;;  %5381 = vmatpush3.bf16.msra.mxu1 %v5584_v34  ;;  %5787 = vrcp.f32 %v2448_v48  ;;  %5382 = vmatprep.mubr.msk.bf16.mxu1 %vm5862_vm1, %v7475_v53  ;;  %v5590_v48 = vld [vmem:[%s7426_s2 + $0x88] sm:$0xff]  }
 0x246   :  { %v2695_v52 = vpack.c.bf16 %v2642_v45, %v2641_v59  ;;  %5392 = vmatprep.subr.bf16.mxu1 %v7475_v53  ;;  %5789 = vrcp.f32 %v2451_v11  ;;  %v2643_v55 = vmul.f32 %v5778_v1, %v6689_v5 }
 0x247   :  { %v5780_v6 = vpop.eup %5779 }
 0x248   :  { %v2457_v35 = vpop.xlane.xlu0 %2456  ;;  %v2454_v8 = vpop.xlane.xlu1 %2453  ;;  %v2644_v29 = vmul.f32 %v5780_v6, %v6696_v31  ;;  %5377 = vmatmul.mubr.msk.bf16.vlgmr.msra.gmra.mrb[84].mxu0 %vm166_vm0, %v2695_v52  ;;  %v5591_v6 = vld [vmem:[%s7426_s2 + $0x90] sm:$0xff]  }
 0x249   :  { %v5782_v0 = vpop.eup %5781  ;;  %5791 = vrcp.f32 %v2454_v8  ;;  %5387 = vmatpush3.bf16.msra.mxu0 %v5585_v12  ;;  %5388 = vmatprep.mubr.msk.bf16.mxu0 %vm5862_vm1, %v7475_v53 }
 0x24a   :  { %v2696_v30 = vpack.c.bf16 %v2644_v29, %v2643_v55  ;;  %5398 = vmatprep.subr.bf16.mxu0 %v7475_v53  ;;  %5793 = vrcp.f32 %v2457_v35  ;;  %v2645_v31 = vmul.f32 %v5782_v0, %v6699_v37 }
 0x24b   :  { %v5784_v46 = vpop.eup %5783 }
 0x24c   :  { %v2463_v5 = vpop.xlane.xlu0 %2462  ;;  %v2460_v58 = vpop.xlane.xlu1 %2459  ;;  %v2646_v41 = vmul.f32 %v5784_v46, %v6706_v47  ;;  %5383 = vmatmul.mubr.msk.bf16.vlgmr.msra.gmra.mrb[84].mxu1 %vm166_vm0, %v2696_v30 }
 0x24d   :  { %v5786_v36 = vpop.eup %5785  ;;  %5393 = vmatpush3.bf16.msra.mxu1 %v5586_v2  ;;  %5795 = vrcp.f32 %v2460_v58  ;;  %5394 = vmatprep.mubr.msk.bf16.mxu1 %vm5862_vm1, %v7475_v53  ;;  %v5592_v2 = vld [vmem:[%s7426_s2 + $0x98] sm:$0xff]  }
 0x24e   :  { %v2697_v17 = vpack.c.bf16 %v2646_v41, %v2645_v31  ;;  %5404 = vmatprep.subr.bf16.mxu1 %v7475_v53  ;;  %5797 = vrcp.f32 %v2463_v5  ;;  %v2647_v47 = vmul.f32 %v5786_v36, %v6709_v32  ;;  %v5593_v41 = vld [vmem:[%s7426_s2 + $0xa0] sm:$0xff]  }
 0x24f   :  { %v5788_v16 = vpop.eup %5787 }
 0x250   :  { %v2469_v37 = vpop.xlane.xlu0 %2468  ;;  %v2466_v15 = vpop.xlane.xlu1 %2465  ;;  %v2648_v38 = vmul.f32 %v5788_v16, %v6716_v19  ;;  %5389 = vmatmul.mubr.msk.bf16.vlgmr.msra.gmra.mrb[88].mxu0 %vm166_vm0, %v2697_v17 }
 0x251   :  { %v5790_v3 = vpop.eup %5789  ;;  %5799 = vrcp.f32 %v2466_v15  ;;  %5399 = vmatpush3.bf16.msra.mxu0 %v5587_v62  ;;  %5400 = vmatprep.mubr.msk.bf16.mxu0 %vm5862_vm1, %v7475_v53  ;;  %v5594_v15 = vld [vmem:[%s7426_s2 + $0xa8] sm:$0xff]  }
 0x252   :  { %v2698_v44 = vpack.c.bf16 %v2648_v38, %v2647_v47  ;;  %5410 = vmatprep.subr.bf16.mxu0 %v7475_v53  ;;  %5801 = vrcp.f32 %v2469_v37  ;;  %v2649_v19 = vmul.f32 %v5790_v3, %v6719_v54 }
 0x253   :  { %v5792_v39 = vpop.eup %5791 }
 0x254   :  { %v2475_v32 = vpop.xlane.xlu0 %2474  ;;  %v2472_v21 = vpop.xlane.xlu1 %2471  ;;  %v2650_v7 = vmul.f32 %v5792_v39, %v6726_v9  ;;  %5395 = vmatmul.mubr.msk.bf16.vlgmr.msra.gmra.mrb[88].mxu1 %vm166_vm0, %v2698_v44  ;;  %v5595_v39 = vld [vmem:[%s7426_s2 + $0xb0] sm:$0xff]  }
 0x255   :  { %v5794_v27 = vpop.eup %5793  ;;  %5405 = vmatpush3.bf16.msra.mxu1 %v5588_v50  ;;  %5803 = vrcp.f32 %v2472_v21  ;;  %5406 = vmatprep.mubr.msk.bf16.mxu1 %vm5862_vm1, %v7475_v53 }
 0x256   :  { %v2699_v42 = vpack.c.bf16 %v2650_v7, %v2649_v19  ;;  %5416 = vmatprep.subr.bf16.mxu1 %v7475_v53  ;;  %5805 = vrcp.f32 %v2475_v32  ;;  %v2651_v9 = vmul.f32 %v5794_v27, %v6729_v61 }
 0x257   :  { %v5796_v34 = vpop.eup %5795 }
 0x258   :  { %v2481_v54 = vpop.xlane.xlu0 %2480  ;;  %v2478_v57 = vpop.xlane.xlu1 %2477  ;;  %v2652_v56 = vmul.f32 %v5796_v34, %v6736_v23  ;;  %5401 = vmatmul.mubr.msk.bf16.vlgmr.msra.gmra.mrb[92].mxu0 %vm166_vm0, %v2699_v42 }
 0x259   :  { %v5798_v11 = vpop.eup %5797  ;;  %5807 = vrcp.f32 %v2478_v57  ;;  %5411 = vmatpush3.bf16.msra.mxu0 %v5589_v24  ;;  %5412 = vmatprep.mubr.msk.bf16.mxu0 %vm5862_vm1, %v7475_v53  ;;  %v5596_v24 = vld [vmem:[%s7426_s2 + $0xb8] sm:$0xff]  }
 0x25a   :  { %v2700_v59 = vpack.c.bf16 %v2652_v56, %v2651_v9  ;;  %5422 = vmatprep.subr.bf16.mxu0 %v7475_v53  ;;  %5809 = vrcp.f32 %v2481_v54  ;;  %v2653_v23 = vmul.f32 %v5798_v11, %v6739_v20  ;;  %v5597_v56 = vld [vmem:[%s7426_s2 + $0xc0] sm:$0xff]  }
 0x25b   :  { %v5800_v45 = vpop.eup %5799 }
 0x25c   :  { %v2487_v61 = vpop.xlane.xlu0 %2486  ;;  %v2484_v1 = vpop.xlane.xlu1 %2483  ;;  %v2654_v12 = vmul.f32 %v5800_v45, %v6746_v26  ;;  %5407 = vmatmul.mubr.msk.bf16.vlgmr.msra.gmra.mrb[92].mxu1 %vm166_vm0, %v2700_v59 }
 0x25d   :  { %v5802_v52 = vpop.eup %5801  ;;  %5417 = vmatpush3.bf16.msra.mxu1 %v5590_v48  ;;  %5811 = vrcp.f32 %v2484_v1  ;;  %5418 = vmatprep.mubr.msk.bf16.mxu1 %vm5862_vm1, %v7475_v53 }
 0x25e   :  { %v2701_v35 = vpack.c.bf16 %v2654_v12, %v2653_v23  ;;  %5428 = vmatprep.subr.bf16.mxu1 %v7475_v53  ;;  %5813 = vrcp.f32 %v2487_v61  ;;  %v2655_v26 = vmul.f32 %v5802_v52, %v6749_v25  ;;  %v7507_v61 = vld [vmem:[#allocation2_spill] sm:$0xff]  ;;  %v5598_v12 = vld [vmem:[%s7426_s2 + $0xc8] sm:$0xff]  }
 0x25f   :  { %v5804_v8 = vpop.eup %5803 }
 0x260   :  { %v2493_v20 = vpop.xlane.xlu0 %2492  ;;  %v2490_v55 = vpop.xlane.xlu1 %2489  ;;  %v2656_v29 = vmul.f32 %v5804_v8, %v6756_v18  ;;  %5413 = vmatmul.mubr.msk.bf16.vlgmr.msra.gmra.mrb[96].mxu0 %vm166_vm0, %v2701_v35 }
 0x261   :  { %v5806_v0 = vpop.eup %5805  ;;  %5815 = vrcp.f32 %v2490_v55  ;;  %5423 = vmatpush3.bf16.msra.mxu0 %v5591_v6  ;;  %5424 = vmatprep.mubr.msk.bf16.mxu0 %vm5862_vm1, %v7475_v53 }
 0x262   :  { %v2702_v30 = vpack.c.bf16 %v2656_v29, %v2655_v26  ;;  %5434 = vmatprep.subr.bf16.mxu0 %v7475_v53  ;;  %5817 = vrcp.f32 %v2493_v20  ;;  %v2657_v18 = vmul.f32 %v5806_v0, %v6759_v51  ;;  %v7508_v20 = vld [vmem:[#allocation4_spill] sm:$0xff]  ;;  %v7509_v26 = vld [vmem:[#allocation5_spill] sm:$0xff] }
 0x263   :  { %v5808_v46 = vpop.eup %5807 }
 0x264   :  { %v2499_v25 = vpop.xlane.xlu0 %2498  ;;  %v2496_v5 = vpop.xlane.xlu1 %2495  ;;  %v2658_v58 = vmul.f32 %v5808_v46, %v6766_v60  ;;  %5419 = vmatmul.mubr.msk.bf16.vlgmr.msra.gmra.mrb[96].mxu1 %vm166_vm0, %v2702_v30 }
 0x265   :  { %v5810_v31 = vpop.eup %5809  ;;  %5429 = vmatpush3.bf16.msra.mxu1 %v5592_v2  ;;  %5819 = vrcp.f32 %v2496_v5  ;;  %5430 = vmatprep.mubr.msk.bf16.mxu1 %vm5862_vm1, %v7475_v53  ;;  %v5599_v2 = vld [vmem:[%s7426_s2 + $0xd0] sm:$0xff]  }
 0x266   :  { %v2703_v36 = vpack.c.bf16 %v2658_v58, %v2657_v18  ;;  %5440 = vmatprep.subr.bf16.mxu1 %v7475_v53  ;;  %5821 = vrcp.f32 %v2499_v25  ;;  %v2659_v60 = vmul.f32 %v5810_v31, %v6769_v63  ;;  %v7510_v18 = vld [vmem:[#allocation7_spill] sm:$0xff]  ;;  %v7511_v31 = vld [vmem:[#allocation6_spill] sm:$0xff] }
 0x267   :  { %v5812_v62 = vpop.eup %5811 }
 0x268   :  { %v2505_v51 = vpop.xlane.xlu0 %2504  ;;  %v2502_v17 = vpop.xlane.xlu1 %2501  ;;  %v2660_v16 = vmul.f32 %v5812_v62, %v6776_v13  ;;  %5425 = vmatmul.mubr.msk.bf16.vlgmr.msra.gmra.mrb[100].mxu0 %vm166_vm0, %v2703_v36  ;;  %v5600_v62 = vld [vmem:[%s7426_s2 + $0xd8] sm:$0xff]  }
 0x269   :  { %v5814_v37 = vpop.eup %5813  ;;  %5823 = vrcp.f32 %v2502_v17  ;;  %5435 = vmatpush3.bf16.msra.mxu0 %v5593_v41  ;;  %5436 = vmatprep.mubr.msk.bf16.mxu0 %vm5862_vm1, %v7475_v53 }
 0x26a   :  { %v2704_v47 = vpack.c.bf16 %v2660_v16, %v2659_v60  ;;  %5446 = vmatprep.subr.bf16.mxu0 %v7475_v53  ;;  %5825 = vrcp.f32 %v2505_v51  ;;  %v2661_v13 = vmul.f32 %v5814_v37, %v6779_v28  ;;  %v7512_v37 = vld [vmem:[#allocation8_spill] sm:$0xff] }
 0x26b   :  { %v5816_v38 = vpop.eup %5815 }
 0x26c   :  { %v2511_v63 = vpop.xlane.xlu0 %2510  ;;  %v2508_v3 = vpop.xlane.xlu1 %2507  ;;  %v2662_v50 = vmul.f32 %v5816_v38, %v6786_v33  ;;  %5431 = vmatmul.mubr.msk.bf16.vlgmr.msra.gmra.mrb[100].mxu1 %vm166_vm0, %v2704_v47  ;;  %v7513_v47 = vld [vmem:[#allocation9_spill] sm:$0xff] }
 0x26d   :  { %v5818_v44 = vpop.eup %5817  ;;  %5441 = vmatpush3.bf16.msra.mxu1 %v5594_v15  ;;  %5827 = vrcp.f32 %v2508_v3  ;;  %5442 = vmatprep.mubr.msk.bf16.mxu1 %vm5862_vm1, %v7475_v53  ;;  %v5601_v3 = vld [vmem:[%s7426_s2 + $0xe0] sm:$0xff]  }
 0x26e   :  { %v2705_v32 = vpack.c.bf16 %v2662_v50, %v2661_v13  ;;  %5452 = vmatprep.subr.bf16.mxu1 %v7475_v53  ;;  %5829 = vrcp.f32 %v2511_v63  ;;  %v2663_v33 = vmul.f32 %v5818_v44, %v6789_v40 }
 0x26f   :  { %v5820_v21 = vpop.eup %5819 }
 0x270   :  { %v2517_v28 = vpop.xlane.xlu0 %2516  ;;  %v2514_v19 = vpop.xlane.xlu1 %2513  ;;  %v2664_v7 = vmul.f32 %v5820_v21, %v6796_v14  ;;  %5437 = vmatmul.mubr.msk.bf16.vlgmr.msra.gmra.mrb[104].mxu0 %vm166_vm0, %v2705_v32  ;;  %v7514_v32 = vld [vmem:[#allocation11_spill] sm:$0xff] }
 0x271   :  { %v5822_v27 = vpop.eup %5821  ;;  %5831 = vrcp.f32 %v2514_v19  ;;  %5447 = vmatpush3.bf16.msra.mxu0 %v5595_v39  ;;  %5448 = vmatprep.mubr.msk.bf16.mxu0 %vm5862_vm1, %v7475_v53 }
 0x272   :  { %v2706_v42 = vpack.c.bf16 %v2664_v7, %v2663_v33  ;;  %5458 = vmatprep.subr.bf16.mxu0 %v7475_v53  ;;  %5833 = vrcp.f32 %v2517_v28  ;;  %v2665_v14 = vmul.f32 %v5822_v27, %v6799_v49  ;;  %v5602_v33 = vld [vmem:[%s7426_s2 + $0xe8] sm:$0xff]  }
 0x273   :  { %v5824_v34 = vpop.eup %5823 }
 0x274   :  { %v2523_v40 = vpop.xlane.xlu0 %2522  ;;  %v2520_v54 = vpop.xlane.xlu1 %2519  ;;  %v2666_v57 = vmul.f32 %v5824_v34, %v6806_v4  ;;  %5443 = vmatmul.mubr.msk.bf16.vlgmr.msra.gmra.mrb[104].mxu1 %vm166_vm0, %v2706_v42  ;;  %v7506_v4 = vld [vmem:[#allocation3_spill] sm:$0xff] }
 0x275   :  { %v5826_v9 = vpop.eup %5825  ;;  %5453 = vmatpush3.bf16.msra.mxu1 %v5596_v24  ;;  %5835 = vrcp.f32 %v2520_v54  ;;  %5454 = vmatprep.mubr.msk.bf16.mxu1 %vm5862_vm1, %v7475_v53 }
 0x276   :  { %v2707_v11 = vpack.c.bf16 %v2666_v57, %v2665_v14  ;;  %5464 = vmatprep.subr.bf16.mxu1 %v7475_v53  ;;  %5837 = vrcp.f32 %v2523_v40  ;;  %v2667_v45 = vmul.f32 %v5826_v9, %v7506_v4  ;;  %v5603_v40 = vld [vmem:[%s7426_s2 + $0xf0] sm:$0xff]   ;;  %v7515_v57 = vld [vmem:[#allocation10_spill] sm:$0xff]  ;;  %v7517_v4 = vld [vmem:[#allocation13_spill] sm:$0xff] }
 0x277   :  { %v5828_v48 = vpop.eup %5827  ;;  %v7516_v9 = vld [vmem:[#allocation12_spill] sm:$0xff] }
 0x278   :  { %v2529_v49 = vpop.xlane.xlu0 %2528  ;;  %v2526_v59 = vpop.xlane.xlu1 %2525  ;;  %v2668_v1 = vmul.f32 %v5828_v48, %v7507_v61  ;;  %5449 = vmatmul.mubr.msk.bf16.vlgmr.msra.gmra.mrb[108].mxu0 %vm166_vm0, %v2707_v11  ;;  %v5604_v11 = vld [vmem:[%s7426_s2 + $0xf8] sm:$0xff]   ;;  %v7518_v61 = vld [vmem:[#allocation15_spill] sm:$0xff] }
 0x279   :  { %v5830_v23 = vpop.eup %5829  ;;  %5839 = vrcp.f32 %v2526_v59  ;;  %5459 = vmatpush3.bf16.msra.mxu0 %v5597_v56  ;;  %5460 = vmatprep.mubr.msk.bf16.mxu0 %vm5862_vm1, %v7475_v53 }
 0x27a   :  { %v2708_v52 = vpack.c.bf16 %v2668_v1, %v2667_v45  ;;  %5470 = vmatprep.subr.bf16.mxu0 %v7475_v53  ;;  %5841 = vrcp.f32 %v2529_v49  ;;  %v2669_v55 = vmul.f32 %v5830_v23, %v7508_v20 }
 0x27b   :  { %v5832_v6 = vpop.eup %5831 }
 0x27c   :  { %v2535_v35 = vpop.xlane.xlu0 %2534  ;;  %v2532_v8 = vpop.xlane.xlu1 %2531  ;;  %v2670_v29 = vmul.f32 %v5832_v6, %v7509_v26  ;;  %5455 = vmatmul.mubr.msk.bf16.vlgmr.msra.gmra.mrb[108].mxu1 %vm166_vm0, %v2708_v52  ;;  %v7519_v52 = vld [vmem:[#allocation14_spill] sm:$0xff] }
 0x27d   :  { %v5834_v0 = vpop.eup %5833  ;;  %5465 = vmatpush3.bf16.msra.mxu1 %v5598_v12  ;;  %5843 = vrcp.f32 %v2532_v8  ;;  %5466 = vmatprep.mubr.msk.bf16.mxu1 %vm5862_vm1, %v7475_v53 }
 0x27e   :  { %v2709_v30 = vpack.c.bf16 %v2670_v29, %v2669_v55  ;;  %5476 = vmatprep.subr.bf16.mxu1 %v7475_v53  ;;  %5845 = vrcp.f32 %v2535_v35  ;;  %v2671_v58 = vmul.f32 %v5834_v0, %v7510_v18  ;;  %v7520_v35 = vld [vmem:[#allocation16_spill] sm:$0xff] }
 0x27f   :  { %v5836_v46 = vpop.eup %5835 }
 0x280   :  { %v2541_v25 = vpop.xlane.xlu0 %2540  ;;  %v2538_v5 = vpop.xlane.xlu1 %2537  ;;  %v2672_v41 = vmul.f32 %v5836_v46, %v7511_v31  ;;  %5461 = vmatmul.mubr.msk.bf16.vlgmr.msra.gmra.mrb[112].mxu0 %vm166_vm0, %v2709_v30 }
 0x281   :  { %v5838_v36 = vpop.eup %5837  ;;  %5847 = vrcp.f32 %v2538_v5  ;;  %5471 = vmatpush3.bf16.msra.mxu0 %v5599_v2  ;;  %5472 = vmatprep.mubr.msk.bf16.mxu0 %vm5862_vm1, %v7475_v53 }
 0x282   :  { %v2710_v51 = vpack.c.bf16 %v2672_v41, %v2671_v58  ;;  %5482 = vmatprep.subr.bf16.mxu0 %v7475_v53  ;;  %5849 = vrcp.f32 %v2541_v25  ;;  %v2673_v15 = vmul.f32 %v5838_v36, %v7512_v37 }
 0x283   :  { %v5840_v17 = vpop.eup %5839 }
 0x284   :  { %v2547_v60 = vpop.xlane.xlu0 %2546  ;;  %v2544_v16 = vpop.xlane.xlu1 %2543  ;;  %v2674_v38 = vmul.f32 %v5840_v17, %v7513_v47  ;;  %5467 = vmatmul.mubr.msk.bf16.vlgmr.msra.gmra.mrb[112].mxu1 %vm166_vm0, %v2710_v51 }
 0x285   :  { %v5842_v63 = vpop.eup %5841  ;;  %5477 = vmatpush3.bf16.msra.mxu1 %v5600_v62  ;;  %5851 = vrcp.f32 %v2544_v16  ;;  %5478 = vmatprep.mubr.msk.bf16.mxu1 %vm5862_vm1, %v7475_v53 }
 0x286   :  { %v2711_v13 = vpack.c.bf16 %v2674_v38, %v2673_v15  ;;  %5488 = vmatprep.subr.bf16.mxu1 %v7475_v53  ;;  %5853 = vrcp.f32 %v2547_v60  ;;  %v2675_v21 = vmul.f32 %v5842_v63, %v7514_v32 }
 0x287   :  { %v5844_v50 = vpop.eup %5843 }
 0x288   :  { %v2553_v44 = vpop.xlane.xlu0 %2552  ;;  %v2550_v39 = vpop.xlane.xlu1 %2549  ;;  %v2676_v28 = vmul.f32 %v5844_v50, %v6856_v22  ;;  %5473 = vmatmul.mubr.msk.bf16.vlgmr.msra.gmra.mrb[116].mxu0 %vm166_vm0, %v2711_v13 }
 0x289   :  { %v5846_v19 = vpop.eup %5845  ;;  %5855 = vrcp.f32 %v2550_v39  ;;  %5483 = vmatpush3.bf16.msra.mxu0 %v5601_v3  ;;  %5484 = vmatprep.mubr.msk.bf16.mxu0 %vm5862_vm1, %v7475_v53 }
 0x28a   :  { %5857 = vrcp.f32 %v2553_v44  ;;  %v2712_v7 = vpack.c.bf16 %v2676_v28, %v2675_v21  ;;  %5494 = vmatprep.subr.bf16.mxu0 %v7475_v53  ;;  %v2677_v22 = vmul.f32 %v5846_v19, %v6859_v43 }
 0x28b   :  { %v5848_v27 = vpop.eup %5847 }
 0x28c   :  { %v2556_v24 = vpop.xlane.xlu1 %2555  ;;  %v2678_v42 = vmul.f32 %v5848_v27, %v6866_v10  ;;  %5479 = vmatmul.mubr.msk.bf16.vlgmr.msra.gmra.mrb[116].mxu1 %vm166_vm0, %v2712_v7  ;;  %v5850_v34 = vpop.eup %5849 }
 0x28d   :  { %5859 = vrcp.f32 %v2556_v24  ;;  %5489 = vmatpush3.bf16.msra.mxu1 %v5602_v33  ;;  %5490 = vmatprep.mubr.msk.bf16.mxu1 %vm5862_vm1, %v7475_v53  ;;  %v2679_v43 = vmul.f32 %v5850_v34, %v7515_v57 }
 0x28e   :  { %v2713_v54 = vpack.c.bf16 %v2678_v42, %v2677_v22  ;;  %5500 = vmatprep.subr.bf16.mxu1 %v7475_v53 }
 0x28f   :  { %v5852_v14 = vpop.eup %5851 }
 0x290   :  { %v2680_v10 = vmul.f32 %v5852_v14, %v7516_v9  ;;  %5485 = vmatmul.mubr.msk.bf16.vlgmr.msra.gmra.mrb[120].mxu0 %vm166_vm0, %v2713_v54  ;;  %v5854_v56 = vpop.eup %5853 }
 0x291   :  { %5495 = vmatpush3.bf16.msra.mxu0 %v5603_v40  ;;  %5496 = vmatprep.mubr.msk.bf16.mxu0 %vm5862_vm1, %v7475_v53  ;;  %v2681_v45 = vmul.f32 %v5854_v56, %v7517_v4 }
 0x292   :  { %v2714_v48 = vpack.c.bf16 %v2680_v10, %v2679_v43 }
 0x293   :  { %v5856_v49 = vpop.eup %5855 }
 0x294   :  { %v5858_v59 = vpop.eup %5857  ;;  %v2682_v1 = vmul.f32 %v5856_v49, %v7518_v61  ;;  %5491 = vmatmul.mubr.msk.bf16.vlgmr.msra.gmra.mrb[120].mxu1 %vm166_vm0, %v2714_v48 }
 0x295   :  { %5501 = vmatpush3.bf16.msra.mxu1 %v5604_v11  ;;  %5502 = vmatprep.mubr.msk.bf16.mxu1 %vm5862_vm1, %v7475_v53  ;;  %v2683_v6 = vmul.f32 %v5858_v59, %v7519_v52 }
 0x296   :  { %v2715_v12 = vpack.c.bf16 %v2682_v1, %v2681_v45 }
 0x297   :  { %v5860_v23 = vpop.eup %5859 }
 0x298   :  { %v2684_v8 = vmul.f32 %v5860_v23, %v7520_v35  ;;  %5497 = vmatmul.mubr.msk.bf16.vlgmr.msra.gmra.mrb[124].mxu0 %vm166_vm0, %v2715_v12 }
 0x29a   :  { %v2716_v20 = vpack.c.bf16 %v2684_v8, %v2683_v6 }
 0x29c   :  { %5503 = vmatmul.mubr.msk.bf16.vlgmr.msra.gmra.mrb[124].mxu1 %vm166_vm0, %v2716_v20 }
 0x2f3   :  { %v2824_v55 = vpop.f32.mrb[64].mxu0 }
 0x2f4   :  { %v4930_v26 = vpack.c.bf16 %v2824_v55, %v2824_v55  ;;  %v5318_v29 = vpop.f32.mrb[65].mxu0 }
 0x2f5   :  { %v2827_v0 = vpop.f32.mrb[66].mxu0 }
 0x2f6   :  { %4638 = vst.msk [vmem:[%s7427_s3] sm:$0xf] %vm4637_vm4, %v4930_v26  ;;  %v4931_v53 = vpack.c.bf16 %v2827_v0, %v2827_v0  ;;  %v5319_v2 = vpop.f32.mrb[67].mxu0 }
 0x2f7   :  { %v2874_v30 = vpop.f32.mrb[64].mxu1 }
 0x2f8   :  { %4639 = vst.msk [vmem:[%s7427_s3 + $0x4] sm:$0xf] %vm4637_vm4, %v4931_v53  ;;  %v4932_v46 = vpack.c.bf16 %v2874_v30, %v2874_v30  ;;  %v5324_v25 = vpop.f32.mrb[65].mxu1 }
 0x2f9   :  { %v2877_v5 = vpop.f32.mrb[66].mxu1 }
 0x2fa   :  { %4640 = vst.msk [vmem:[%s7427_s3 + $0x8] sm:$0xf] %vm4637_vm4, %v4932_v46  ;;  %v4933_v18 = vpack.c.bf16 %v2877_v5, %v2877_v5  ;;  %v5325_v58 = vpop.f32.mrb[67].mxu1 }
 0x2fb   :  { %v2924_v31 = vpop.f32.mrb[68].mxu0 }
 0x2fc   :  { %4641 = vst.msk [vmem:[%s7427_s3 + $0xc] sm:$0xf] %vm4637_vm4, %v4933_v18  ;;  %v4934_v41 = vpack.c.bf16 %v2924_v31, %v2924_v31  ;;  %v5330_v36 = vpop.f32.mrb[69].mxu0 }
 0x2fd   :  { %v2927_v62 = vpop.f32.mrb[70].mxu0 }
 0x2fe   :  { %4642 = vst.msk [vmem:[%s7427_s3 + $0x10] sm:$0xf] %vm4637_vm4, %v4934_v41  ;;  %v4935_v51 = vpack.c.bf16 %v2927_v62, %v2927_v62  ;;  %v5331_v17 = vpop.f32.mrb[71].mxu0 }
 0x2ff   :  { %v2974_v60 = vpop.f32.mrb[68].mxu1 }
 0x300   :  { %4643 = vst.msk [vmem:[%s7427_s3 + $0x14] sm:$0xf] %vm4637_vm4, %v4935_v51  ;;  %v4936_v16 = vpack.c.bf16 %v2974_v60, %v2974_v60  ;;  %v5336_v37 = vpop.f32.mrb[69].mxu1 }
 0x301   :  { %v2977_v15 = vpop.f32.mrb[70].mxu1 }
 0x302   :  { %4644 = vst.msk [vmem:[%s7427_s3 + $0x18] sm:$0xf] %vm4637_vm4, %v4936_v16  ;;  %v4937_v47 = vpack.c.bf16 %v2977_v15, %v2977_v15  ;;  %v5337_v38 = vpop.f32.mrb[71].mxu1 }
 0x303   :  { %v3024_v63 = vpop.f32.mrb[72].mxu0 }
 0x304   :  { %4645 = vst.msk [vmem:[%s7427_s3 + $0x1c] sm:$0xf] %vm4637_vm4, %v4937_v47  ;;  %v4938_v3 = vpack.c.bf16 %v3024_v63, %v3024_v63  ;;  %v5342_v13 = vpop.f32.mrb[73].mxu0 }
 0x305   :  { %v3027_v50 = vpop.f32.mrb[74].mxu0 }
 0x306   :  { %4646 = vst.msk [vmem:[%s7427_s3 + $0x20] sm:$0xf] %vm4637_vm4, %v4938_v3  ;;  %v4939_v44 = vpack.c.bf16 %v3027_v50, %v3027_v50  ;;  %v5343_v39 = vpop.f32.mrb[75].mxu0 }
 0x307   :  { %v3074_v32 = vpop.f32.mrb[72].mxu1 }
 0x308   :  { %4647 = vst.msk [vmem:[%s7427_s3 + $0x24] sm:$0xf] %vm4637_vm4, %v4939_v44  ;;  %v4940_v21 = vpack.c.bf16 %v3074_v32, %v3074_v32  ;;  %v5348_v28 = vpop.f32.mrb[73].mxu1 }
 0x309   :  { %v3077_v19 = vpop.f32.mrb[74].mxu1 }
 0x30a   :  { %4648 = vst.msk [vmem:[%s7427_s3 + $0x28] sm:$0xf] %vm4637_vm4, %v4940_v21  ;;  %v4941_v33 = vpack.c.bf16 %v3077_v19, %v3077_v19  ;;  %v5349_v7 = vpop.f32.mrb[75].mxu1 }
 0x30b   :  { %v3124_v27 = vpop.f32.mrb[76].mxu0 }
 0x30c   :  { %4649 = vst.msk [vmem:[%s7427_s3 + $0x2c] sm:$0xf] %vm4637_vm4, %v4941_v33  ;;  %v4942_v24 = vpack.c.bf16 %v3124_v27, %v3124_v27  ;;  %v5354_v22 = vpop.f32.mrb[77].mxu0 }
 0x30d   :  { %v3127_v42 = vpop.f32.mrb[78].mxu0 }
 0x30e   :  { %4650 = vst.msk [vmem:[%s7427_s3 + $0x30] sm:$0xf] %vm4637_vm4, %v4942_v24  ;;  %v4943_v34 = vpack.c.bf16 %v3127_v42, %v3127_v42  ;;  %v5355_v40 = vpop.f32.mrb[79].mxu0 }
 0x30f   :  { %v3174_v54 = vpop.f32.mrb[76].mxu1 }
 0x310   :  { %4651 = vst.msk [vmem:[%s7427_s3 + $0x34] sm:$0xf] %vm4637_vm4, %v4943_v34  ;;  %v4944_v14 = vpack.c.bf16 %v3174_v54, %v3174_v54  ;;  %v5360_v57 = vpop.f32.mrb[77].mxu1 }
 0x311   :  { %v3177_v43 = vpop.f32.mrb[78].mxu1 }
 0x312   :  { %4652 = vst.msk [vmem:[%s7427_s3 + $0x38] sm:$0xf] %vm4637_vm4, %v4944_v14  ;;  %v4945_v9 = vpack.c.bf16 %v3177_v43, %v3177_v43  ;;  %v5361_v10 = vpop.f32.mrb[79].mxu1 }
 0x313   :  { %v3224_v56 = vpop.f32.mrb[80].mxu0 }
 0x314   :  { %4653 = vst.msk [vmem:[%s7427_s3 + $0x3c] sm:$0xf] %vm4637_vm4, %v4945_v9  ;;  %v4946_v11 = vpack.c.bf16 %v3224_v56, %v3224_v56  ;;  %v5366_v48 = vpop.f32.mrb[81].mxu0 }
 0x315   :  { %v3227_v49 = vpop.f32.mrb[82].mxu0 }
 0x316   :  { %4654 = vst.msk [vmem:[%s7427_s3 + $0x40] sm:$0xf] %vm4637_vm4, %v4946_v11  ;;  %v4947_v59 = vpack.c.bf16 %v3227_v49, %v3227_v49  ;;  %v5367_v4 = vpop.f32.mrb[83].mxu0 }
 0x317   :  { %v3274_v45 = vpop.f32.mrb[80].mxu1 }
 0x318   :  { %4655 = vst.msk [vmem:[%s7427_s3 + $0x44] sm:$0xf] %vm4637_vm4, %v4947_v59  ;;  %v4948_v61 = vpack.c.bf16 %v3274_v45, %v3274_v45  ;;  %v5372_v1 = vpop.f32.mrb[81].mxu1 }
 0x319   :  { %v3277_v23 = vpop.f32.mrb[82].mxu1 }
 0x31a   :  { %4656 = vst.msk [vmem:[%s7427_s3 + $0x48] sm:$0xf] %vm4637_vm4, %v4948_v61  ;;  %v4949_v12 = vpack.c.bf16 %v3277_v23, %v3277_v23  ;;  %v5373_v52 = vpop.f32.mrb[83].mxu1 }
 0x31b   :  { %v3324_v6 = vpop.f32.mrb[84].mxu0 }
 0x31c   :  { %4657 = vst.msk [vmem:[%s7427_s3 + $0x4c] sm:$0xf] %vm4637_vm4, %v4949_v12  ;;  %v4950_v35 = vpack.c.bf16 %v3324_v6, %v3324_v6  ;;  %v5378_v8 = vpop.f32.mrb[85].mxu0 }
 0x31d   :  { %v3327_v20 = vpop.f32.mrb[86].mxu0 }
 0x31e   :  { %4658 = vst.msk [vmem:[%s7427_s3 + $0x50] sm:$0xf] %vm4637_vm4, %v4950_v35  ;;  %v4951_v55 = vpack.c.bf16 %v3327_v20, %v3327_v20  ;;  %v5379_v26 = vpop.f32.mrb[87].mxu0 }
 0x31f   :  { %v3374_v29 = vpop.f32.mrb[84].mxu1 }
 0x320   :  { %4659 = vst.msk [vmem:[%s7427_s3 + $0x54] sm:$0xf] %vm4637_vm4, %v4951_v55  ;;  %v4952_v0 = vpack.c.bf16 %v3374_v29, %v3374_v29  ;;  %v5384_v53 = vpop.f32.mrb[85].mxu1 }
 0x321   :  { %v3377_v2 = vpop.f32.mrb[86].mxu1 }
 0x322   :  { %4660 = vst.msk [vmem:[%s7427_s3 + $0x58] sm:$0xf] %vm4637_vm4, %v4952_v0  ;;  %v4953_v30 = vpack.c.bf16 %v3377_v2, %v3377_v2  ;;  %v5385_v46 = vpop.f32.mrb[87].mxu1 }
 0x323   :  { %v3424_v25 = vpop.f32.mrb[88].mxu0 }
 0x324   :  { %4661 = vst.msk [vmem:[%s7427_s3 + $0x5c] sm:$0xf] %vm4637_vm4, %v4953_v30  ;;  %v4954_v5 = vpack.c.bf16 %v3424_v25, %v3424_v25  ;;  %v5390_v18 = vpop.f32.mrb[89].mxu0 }
 0x325   :  { %v3427_v58 = vpop.f32.mrb[90].mxu0 }
 0x326   :  { %4662 = vst.msk [vmem:[%s7427_s3 + $0x60] sm:$0xf] %vm4637_vm4, %v4954_v5  ;;  %v4955_v31 = vpack.c.bf16 %v3427_v58, %v3427_v58  ;;  %v5391_v41 = vpop.f32.mrb[91].mxu0 }
 0x327   :  { %v3474_v36 = vpop.f32.mrb[88].mxu1 }
 0x328   :  { %4663 = vst.msk [vmem:[%s7427_s3 + $0x64] sm:$0xf] %vm4637_vm4, %v4955_v31  ;;  %v4956_v62 = vpack.c.bf16 %v3474_v36, %v3474_v36  ;;  %v5396_v51 = vpop.f32.mrb[89].mxu1 }
 0x329   :  { %v3477_v17 = vpop.f32.mrb[90].mxu1 }
 0x32a   :  { %4664 = vst.msk [vmem:[%s7427_s3 + $0x68] sm:$0xf] %vm4637_vm4, %v4956_v62  ;;  %v4957_v60 = vpack.c.bf16 %v3477_v17, %v3477_v17  ;;  %v5397_v16 = vpop.f32.mrb[91].mxu1 }
 0x32b   :  { %v3524_v37 = vpop.f32.mrb[92].mxu0 }
 0x32c   :  { %4665 = vst.msk [vmem:[%s7427_s3 + $0x6c] sm:$0xf] %vm4637_vm4, %v4957_v60  ;;  %v4958_v15 = vpack.c.bf16 %v3524_v37, %v3524_v37  ;;  %v5402_v47 = vpop.f32.mrb[93].mxu0 }
 0x32d   :  { %v3527_v38 = vpop.f32.mrb[94].mxu0 }
 0x32e   :  { %4666 = vst.msk [vmem:[%s7427_s3 + $0x70] sm:$0xf] %vm4637_vm4, %v4958_v15  ;;  %v4959_v63 = vpack.c.bf16 %v3527_v38, %v3527_v38  ;;  %v5403_v3 = vpop.f32.mrb[95].mxu0 }
 0x32f   :  { %v3574_v13 = vpop.f32.mrb[92].mxu1 }
 0x330   :  { %4667 = vst.msk [vmem:[%s7427_s3 + $0x74] sm:$0xf] %vm4637_vm4, %v4959_v63  ;;  %v4960_v50 = vpack.c.bf16 %v3574_v13, %v3574_v13  ;;  %v5408_v44 = vpop.f32.mrb[93].mxu1 }
 0x331   :  { %v3577_v39 = vpop.f32.mrb[94].mxu1 }
 0x332   :  { %4668 = vst.msk [vmem:[%s7427_s3 + $0x78] sm:$0xf] %vm4637_vm4, %v4960_v50  ;;  %v4961_v32 = vpack.c.bf16 %v3577_v39, %v3577_v39  ;;  %v5409_v21 = vpop.f32.mrb[95].mxu1 }
 0x333   :  { %v3624_v28 = vpop.f32.mrb[96].mxu0 }
 0x334   :  { %4669 = vst.msk [vmem:[%s7427_s3 + $0x7c] sm:$0xf] %vm4637_vm4, %v4961_v32  ;;  %v4962_v19 = vpack.c.bf16 %v3624_v28, %v3624_v28  ;;  %v5414_v33 = vpop.f32.mrb[97].mxu0 }
 0x335   :  { %v3627_v7 = vpop.f32.mrb[98].mxu0 }
 0x336   :  { %4670 = vst.msk [vmem:[%s7427_s3 + $0x80] sm:$0xf] %vm4637_vm4, %v4962_v19  ;;  %v4963_v27 = vpack.c.bf16 %v3627_v7, %v3627_v7  ;;  %v5415_v24 = vpop.f32.mrb[99].mxu0 }
 0x337   :  { %v3674_v22 = vpop.f32.mrb[96].mxu1 }
 0x338   :  { %4671 = vst.msk [vmem:[%s7427_s3 + $0x84] sm:$0xf] %vm4637_vm4, %v4963_v27  ;;  %v4964_v42 = vpack.c.bf16 %v3674_v22, %v3674_v22  ;;  %v5420_v34 = vpop.f32.mrb[97].mxu1 }
 0x339   :  { %v3677_v40 = vpop.f32.mrb[98].mxu1 }
 0x33a   :  { %4672 = vst.msk [vmem:[%s7427_s3 + $0x88] sm:$0xf] %vm4637_vm4, %v4964_v42  ;;  %v4965_v54 = vpack.c.bf16 %v3677_v40, %v3677_v40  ;;  %v5421_v14 = vpop.f32.mrb[99].mxu1 }
 0x33b   :  { %v3724_v57 = vpop.f32.mrb[100].mxu0 }
 0x33c   :  { %4673 = vst.msk [vmem:[%s7427_s3 + $0x8c] sm:$0xf] %vm4637_vm4, %v4965_v54  ;;  %v4966_v43 = vpack.c.bf16 %v3724_v57, %v3724_v57  ;;  %v5426_v9 = vpop.f32.mrb[101].mxu0 }
 0x33d   :  { %v3727_v10 = vpop.f32.mrb[102].mxu0 }
 0x33e   :  { %4674 = vst.msk [vmem:[%s7427_s3 + $0x90] sm:$0xf] %vm4637_vm4, %v4966_v43  ;;  %v4967_v56 = vpack.c.bf16 %v3727_v10, %v3727_v10  ;;  %v5427_v11 = vpop.f32.mrb[103].mxu0 }
 0x33f   :  { %v3774_v48 = vpop.f32.mrb[100].mxu1 }
 0x340   :  { %4675 = vst.msk [vmem:[%s7427_s3 + $0x94] sm:$0xf] %vm4637_vm4, %v4967_v56  ;;  %v4968_v49 = vpack.c.bf16 %v3774_v48, %v3774_v48  ;;  %v5432_v59 = vpop.f32.mrb[101].mxu1 }
 0x341   :  { %v3777_v4 = vpop.f32.mrb[102].mxu1 }
 0x342   :  { %4676 = vst.msk [vmem:[%s7427_s3 + $0x98] sm:$0xf] %vm4637_vm4, %v4968_v49  ;;  %v4969_v45 = vpack.c.bf16 %v3777_v4, %v3777_v4  ;;  %v5433_v61 = vpop.f32.mrb[103].mxu1 }
 0x343   :  { %v3824_v1 = vpop.f32.mrb[104].mxu0 }
 0x344   :  { %4677 = vst.msk [vmem:[%s7427_s3 + $0x9c] sm:$0xf] %vm4637_vm4, %v4969_v45  ;;  %v4970_v23 = vpack.c.bf16 %v3824_v1, %v3824_v1  ;;  %v5438_v12 = vpop.f32.mrb[105].mxu0 }
 0x345   :  { %v3827_v52 = vpop.f32.mrb[106].mxu0 }
 0x346   :  { %4678 = vst.msk [vmem:[%s7427_s3 + $0xa0] sm:$0xf] %vm4637_vm4, %v4970_v23  ;;  %v4971_v6 = vpack.c.bf16 %v3827_v52, %v3827_v52  ;;  %v5439_v35 = vpop.f32.mrb[107].mxu0 }
 0x347   :  { %v3874_v8 = vpop.f32.mrb[104].mxu1 }
 0x348   :  { %4679 = vst.msk [vmem:[%s7427_s3 + $0xa4] sm:$0xf] %vm4637_vm4, %v4971_v6  ;;  %v4972_v20 = vpack.c.bf16 %v3874_v8, %v3874_v8  ;;  %v5444_v55 = vpop.f32.mrb[105].mxu1 }
 0x349   :  { %v3877_v26 = vpop.f32.mrb[106].mxu1 }
 0x34a   :  { %4680 = vst.msk [vmem:[%s7427_s3 + $0xa8] sm:$0xf] %vm4637_vm4, %v4972_v20  ;;  %v4973_v29 = vpack.c.bf16 %v3877_v26, %v3877_v26  ;;  %v5445_v0 = vpop.f32.mrb[107].mxu1 }
 0x34b   :  { %v3924_v53 = vpop.f32.mrb[108].mxu0 }
 0x34c   :  { %4681 = vst.msk [vmem:[%s7427_s3 + $0xac] sm:$0xf] %vm4637_vm4, %v4973_v29  ;;  %v4974_v2 = vpack.c.bf16 %v3924_v53, %v3924_v53  ;;  %v5450_v30 = vpop.f32.mrb[109].mxu0 }
 0x34d   :  { %v3927_v46 = vpop.f32.mrb[110].mxu0 }
 0x34e   :  { %4682 = vst.msk [vmem:[%s7427_s3 + $0xb0] sm:$0xf] %vm4637_vm4, %v4974_v2  ;;  %v4975_v25 = vpack.c.bf16 %v3927_v46, %v3927_v46  ;;  %v5451_v5 = vpop.f32.mrb[111].mxu0 }
 0x34f   :  { %v3974_v18 = vpop.f32.mrb[108].mxu1 }
 0x350   :  { %4683 = vst.msk [vmem:[%s7427_s3 + $0xb4] sm:$0xf] %vm4637_vm4, %v4975_v25  ;;  %v4976_v58 = vpack.c.bf16 %v3974_v18, %v3974_v18  ;;  %v5456_v31 = vpop.f32.mrb[109].mxu1 }
 0x351   :  { %v3977_v41 = vpop.f32.mrb[110].mxu1 }
 0x352   :  { %4684 = vst.msk [vmem:[%s7427_s3 + $0xb8] sm:$0xf] %vm4637_vm4, %v4976_v58  ;;  %v4977_v36 = vpack.c.bf16 %v3977_v41, %v3977_v41  ;;  %v5457_v62 = vpop.f32.mrb[111].mxu1 }
 0x353   :  { %v4024_v51 = vpop.f32.mrb[112].mxu0 }
 0x354   :  { %4685 = vst.msk [vmem:[%s7427_s3 + $0xbc] sm:$0xf] %vm4637_vm4, %v4977_v36  ;;  %v4978_v17 = vpack.c.bf16 %v4024_v51, %v4024_v51  ;;  %v5462_v60 = vpop.f32.mrb[113].mxu0 }
 0x355   :  { %v4027_v16 = vpop.f32.mrb[114].mxu0 }
 0x356   :  { %4686 = vst.msk [vmem:[%s7427_s3 + $0xc0] sm:$0xf] %vm4637_vm4, %v4978_v17  ;;  %v4979_v37 = vpack.c.bf16 %v4027_v16, %v4027_v16  ;;  %v5463_v15 = vpop.f32.mrb[115].mxu0 }
 0x357   :  { %v4074_v47 = vpop.f32.mrb[112].mxu1 }
 0x358   :  { %4687 = vst.msk [vmem:[%s7427_s3 + $0xc4] sm:$0xf] %vm4637_vm4, %v4979_v37  ;;  %v4980_v38 = vpack.c.bf16 %v4074_v47, %v4074_v47  ;;  %v5468_v63 = vpop.f32.mrb[113].mxu1 }
 0x359   :  { %v4077_v3 = vpop.f32.mrb[114].mxu1 }
 0x35a   :  { %4688 = vst.msk [vmem:[%s7427_s3 + $0xc8] sm:$0xf] %vm4637_vm4, %v4980_v38  ;;  %v4981_v13 = vpack.c.bf16 %v4077_v3, %v4077_v3  ;;  %v5469_v50 = vpop.f32.mrb[115].mxu1 }
 0x35b   :  { %v4124_v44 = vpop.f32.mrb[116].mxu0 }
 0x35c   :  { %4689 = vst.msk [vmem:[%s7427_s3 + $0xcc] sm:$0xf] %vm4637_vm4, %v4981_v13  ;;  %v4982_v39 = vpack.c.bf16 %v4124_v44, %v4124_v44  ;;  %v5474_v32 = vpop.f32.mrb[117].mxu0 }
 0x35d   :  { %v4127_v21 = vpop.f32.mrb[118].mxu0 }
 0x35e   :  { %4690 = vst.msk [vmem:[%s7427_s3 + $0xd0] sm:$0xf] %vm4637_vm4, %v4982_v39  ;;  %v4983_v28 = vpack.c.bf16 %v4127_v21, %v4127_v21  ;;  %v5475_v19 = vpop.f32.mrb[119].mxu0 }
 0x35f   :  { %v4174_v33 = vpop.f32.mrb[116].mxu1 }
 0x360   :  { %4691 = vst.msk [vmem:[%s7427_s3 + $0xd4] sm:$0xf] %vm4637_vm4, %v4983_v28  ;;  %v4984_v7 = vpack.c.bf16 %v4174_v33, %v4174_v33  ;;  %v5480_v27 = vpop.f32.mrb[117].mxu1 }
 0x361   :  { %v4177_v24 = vpop.f32.mrb[118].mxu1 }
 0x362   :  { %4692 = vst.msk [vmem:[%s7427_s3 + $0xd8] sm:$0xf] %vm4637_vm4, %v4984_v7  ;;  %v4985_v22 = vpack.c.bf16 %v4177_v24, %v4177_v24  ;;  %v5481_v42 = vpop.f32.mrb[119].mxu1 }
 0x363   :  { %v4224_v34 = vpop.f32.mrb[120].mxu0 }
 0x364   :  { %4693 = vst.msk [vmem:[%s7427_s3 + $0xdc] sm:$0xf] %vm4637_vm4, %v4985_v22  ;;  %v4986_v40 = vpack.c.bf16 %v4224_v34, %v4224_v34  ;;  %v5486_v54 = vpop.f32.mrb[121].mxu0 }
 0x365   :  { %v4227_v14 = vpop.f32.mrb[122].mxu0 }
 0x366   :  { %4694 = vst.msk [vmem:[%s7427_s3 + $0xe0] sm:$0xf] %vm4637_vm4, %v4986_v40  ;;  %v4987_v57 = vpack.c.bf16 %v4227_v14, %v4227_v14  ;;  %v5487_v43 = vpop.f32.mrb[123].mxu0 }
 0x367   :  { %v4274_v9 = vpop.f32.mrb[120].mxu1 }
 0x368   :  { %4695 = vst.msk [vmem:[%s7427_s3 + $0xe4] sm:$0xf] %vm4637_vm4, %v4987_v57  ;;  %v4988_v10 = vpack.c.bf16 %v4274_v9, %v4274_v9  ;;  %v5492_v56 = vpop.f32.mrb[121].mxu1 }
 0x369   :  { %v4277_v11 = vpop.f32.mrb[122].mxu1 }
 0x36a   :  { %4696 = vst.msk [vmem:[%s7427_s3 + $0xe8] sm:$0xf] %vm4637_vm4, %v4988_v10  ;;  %v4989_v48 = vpack.c.bf16 %v4277_v11, %v4277_v11  ;;  %v5493_v49 = vpop.f32.mrb[123].mxu1 }
 0x36b   :  { %v4324_v59 = vpop.f32.mrb[124].mxu0 }
 0x36c   :  { %4697 = vst.msk [vmem:[%s7427_s3 + $0xec] sm:$0xf] %vm4637_vm4, %v4989_v48  ;;  %v4990_v4 = vpack.c.bf16 %v4324_v59, %v4324_v59  ;;  %v5498_v45 = vpop.f32.mrb[125].mxu0 }
 0x36d   :  { %v4327_v61 = vpop.f32.mrb[126].mxu0 }
 0x36e   :  { %4698 = vst.msk [vmem:[%s7427_s3 + $0xf0] sm:$0xf] %vm4637_vm4, %v4990_v4  ;;  %v4991_v1 = vpack.c.bf16 %v4327_v61, %v4327_v61  ;;  %v5499_v23 = vpop.f32.mrb[127].mxu0 }
 0x36f   :  { %v4374_v12 = vpop.f32.mrb[124].mxu1 }
 0x370   :  { %4699 = vst.msk [vmem:[%s7427_s3 + $0xf4] sm:$0xf] %vm4637_vm4, %v4991_v1  ;;  %v4992_v52 = vpack.c.bf16 %v4374_v12, %v4374_v12  ;;  %v5504_v6 = vpop.f32.mrb[125].mxu1 }
 0x371   :  { %v4377_v35 = vpop.f32.mrb[126].mxu1 }
 0x372   :  { %4700 = vst.msk [vmem:[%s7427_s3 + $0xf8] sm:$0xf] %vm4637_vm4, %v4992_v52  ;;  %v4993_v8 = vpack.c.bf16 %v4377_v35, %v4377_v35  ;;  %v5505_v20 = vpop.f32.mrb[127].mxu1 }
 0x374   :  { %4701 = vst.msk [vmem:[%s7427_s3 + $0xfc] sm:$0xf] %vm4637_vm4, %v4993_v8 }

</bundles_post_ra>
